<compile_context>
chip_gen: v5e
topology: v5e:2x2
jax: 0.10.0
libtpu: 0.0.40
codegen_flags: <defaults>
</compile_context>

<pallas_src>
import functools

import jax
import jax.numpy as jnp
from jax.experimental import pallas as pl
from jax.experimental.pallas import tpu as pltpu


def _round_up(x, m):
    return (x + m - 1) // m * m


def _pad2(a, rows, cols):
    return jnp.pad(a, ((0, rows - a.shape[0]), (0, cols - a.shape[1])))


def _choose_tiles(n_pad):
    tm = 256                                  # <= 256 keeps v7x 64 MiB VMEM happy
    tk = 512 if n_pad % 512 == 0 else 256     # 128-aligned (v5e), 256-aligned (v6e/v7x)
    return tm, tk


# ---------------------------------------------------------------------------
# Kernels
# ---------------------------------------------------------------------------

def _project_kernel(x_ref, w_ref, o_ref):
    o_ref[...] = jnp.dot(x_ref[...], w_ref[...],
                         preferred_element_type=jnp.float32).astype(o_ref.dtype)


def _project_rows(x_pad, w_pad, tm):
    """H = X @ W, row-tiled; emitted in bf16 to halve the streaming traffic."""
    n_pad, f_in_pad = x_pad.shape
    f_out_pad = w_pad.shape[1]
    return pl.pallas_call(
        _project_kernel,
        out_shape=jax.ShapeDtypeStruct((n_pad, f_out_pad), jnp.bfloat16),
        grid=(n_pad // tm,),
        in_specs=[pl.BlockSpec((tm, f_in_pad), lambda i: (i, 0)),
                  pl.BlockSpec((f_in_pad, f_out_pad), lambda i: (0, 0))],
        out_specs=pl.BlockSpec((tm, f_out_pad), lambda i: (i, 0)),
        compiler_params=pltpu.CompilerParams(dimension_semantics=("parallel",)),
    )(x_pad, w_pad)


def _sage_tiled_kernel(*refs, apply_wl, activation, f_out_valid):
    """One grid step of: out = lin_l(mean_agg) + lin_r(x_root) (+ activation)."""
    if apply_wl:
        a_ref, s_ref, xr_ref, dinv_ref, wl_ref, wr_ref, bl_ref, o_ref, acc_ref = refs
    else:
        a_ref, s_ref, xr_ref, dinv_ref, wr_ref, bl_ref, o_ref, acc_ref = refs
        wl_ref = None

    k = pl.program_id(1)

    @pl.when(k == 0)
    def _():
        acc_ref[...] = jnp.zeros_like(acc_ref)

    # bf16 x bf16 -> f32 accumulate on the MXU (A holds exact small-integer counts).
    acc_ref[...] += jnp.dot(a_ref[...], s_ref[...],
                            preferred_element_type=jnp.float32)

    @pl.when(k == pl.num_programs(1) - 1)
    def _():
        mean = acc_ref[...] * dinv_ref[...]             # per-dst 1/deg scale (VPU)
        if apply_wl:
            lin_l = jnp.dot(mean, wl_ref[...], preferred_element_type=jnp.float32)
        else:
            lin_l = mean                                 # Wl already folded into s
        out = (lin_l
               + jnp.dot(xr_ref[...], wr_ref[...], preferred_element_type=jnp.float32)
               + bl_ref[...])
        if activation == "relu":
            out = jnp.maximum(out, 0.0)
        elif activation == "log_softmax":
            col = jax.lax.broadcasted_iota(jnp.int32, out.shape, 1)
            valid = col < f_out_valid                    # mask zero-padded lanes
            masked = jnp.where(valid, out, -1e30)
            m = jnp.max(masked, axis=1, keepdims=True)
            lse = jnp.log(jnp.sum(jnp.exp(masked - m), axis=1, keepdims=True))
            out = jnp.where(valid, out - m - lse, 0.0)
        o_ref[...] = out.astype(o_ref.dtype)


# ---------------------------------------------------------------------------
# Layer wrapper
# ---------------------------------------------------------------------------

def sage_conv(a_bf, inv_deg, x_pad, layer, activation="none"):
    n_pad = a_bf.shape[0]
    tm, tk = _choose_tiles(n_pad)
    f_in, f_out = layer["f_in"], layer["f_out"]
    f_in_pad = _round_up(f_in, 128)
    f_out_pad = _round_up(f_out, 128)
    w_l = _pad2(layer["w_l"], f_in_pad, f_out_pad)
    w_r = _pad2(layer["w_r"], f_in_pad, f_out_pad)
    b_l = _pad2(layer["b_l"], 1, f_out_pad)

    # Stream the narrower operand through the N^2 aggregation matmul.
    apply_wl = f_in_pad <= f_out_pad
    if apply_wl:
        s = x_pad.astype(jnp.bfloat16)                   # stream X, Wl applied at end
        f_s = f_in_pad
    else:
        s = _project_rows(x_pad, w_l, tm)                # stream H = X @ Wl (bf16)
        f_s = f_out_pad

    kernel = functools.partial(_sage_tiled_kernel, apply_wl=apply_wl,
                               activation=activation, f_out_valid=f_out)

    in_specs = [
        pl.BlockSpec((tm, tk), lambda i, k: (i, k)),         # A (dst, src), bf16
        pl.BlockSpec((tk, f_s), lambda i, k: (k, 0)),        # streamed features, bf16
        pl.BlockSpec((tm, f_in_pad), lambda i, k: (i, 0)),   # dst-row X (root term)
        pl.BlockSpec((tm, 1), lambda i, k: (i, 0)),          # 1/deg per dst row
    ]
    args = [a_bf, s, x_pad, inv_deg]
    if apply_wl:
        in_specs.append(pl.BlockSpec((f_in_pad, f_out_pad), lambda i, k: (0, 0)))
        args.append(w_l)
    in_specs += [
        pl.BlockSpec((f_in_pad, f_out_pad), lambda i, k: (0, 0)),  # Wr (resident)
        pl.BlockSpec((1, f_out_pad), lambda i, k: (0, 0)),         # bias (resident)
    ]
    args += [w_r, b_l]

    flops = 2 * n_pad * n_pad * f_s + 2 * n_pad * f_in_pad * f_out_pad
    if apply_wl:
        flops += 2 * n_pad * f_s * f_out_pad
    bytes_accessed = (a_bf.size * 2 + s.size * 2 + x_pad.size * 4 + inv_deg.size * 4
                      + (w_l.size + w_r.size + b_l.size) * 4 + n_pad * f_out_pad * 4)

    return pl.pallas_call(
        kernel,
        out_shape=jax.ShapeDtypeStruct((n_pad, f_out_pad), jnp.float32),
        grid=(n_pad // tm, n_pad // tk),
        in_specs=in_specs,
        out_specs=pl.BlockSpec((tm, f_out_pad), lambda i, k: (i, 0)),
        scratch_shapes=[pltpu.VMEM((tm, f_s), jnp.float32)],
        compiler_params=pltpu.CompilerParams(
            dimension_semantics=("parallel", "arbitrary"),
            vmem_limit_bytes=32 * 1024 * 1024),
        cost_estimate=pl.CostEstimate(
            flops=int(flops),
            transcendentals=int(n_pad * f_out_pad) if activation == "log_softmax" else 0,
            bytes_accessed=int(bytes_accessed)),
    )(*args)


# ---------------------------------------------------------------------------
# Graph / params / forward
# ---------------------------------------------------------------------------

def build_graph(edge_index, num_nodes):
    """Hoisted, reused across forward calls: bf16 count-adjacency (padded) + f32 1/deg."""
    n_pad = _round_up(num_nodes, 256)
    src, dst = edge_index[0], edge_index[1]
    counts = jnp.zeros((n_pad, n_pad), jnp.float32).at[dst, src].add(1.0)
    deg = jnp.sum(counts, axis=1, keepdims=True)
    inv_deg = jnp.where(deg > 0.0, 1.0 / jnp.maximum(deg, 1.0), 0.0)
    return counts.astype(jnp.bfloat16), inv_deg        # small ints are exact in bf16


def init_sage_layer(key, f_in, f_out):
    k1, k2, k3 = jax.random.split(key, 3)
    bound = 1.0 / float(f_in) ** 0.5
    return {
        "w_l": jax.random.uniform(k1, (f_in, f_out), jnp.float32, -bound, bound),
        "b_l": jax.random.uniform(k2, (1, f_out), jnp.float32, -bound, bound),
        "w_r": jax.random.uniform(k3, (f_in, f_out), jnp.float32, -bound, bound),
        "f_in": f_in, "f_out": f_out,
    }


def init_graphsage(key, in_channels, hidden_channels, out_channels):
    k1, k2, k3 = jax.random.split(key, 3)
    return {
        "conv1": init_sage_layer(k1, in_channels, hidden_channels),
        "conv": init_sage_layer(k2, hidden_channels, hidden_channels),
        "conv2": init_sage_layer(k3, hidden_channels, out_channels),
    }


def graphsage_forward(params, x, a_bf, inv_deg, hidden_layers=1):
    n, f_in = x.shape
    n_pad = a_bf.shape[0]
    x_pad = _pad2(x.astype(jnp.float32), n_pad, _round_up(f_in, 128))
    # dropout (eval mode) -> identity.  # TODO(synk): training-mode dropout
    h = sage_conv(a_bf, inv_deg, x_pad, params["conv1"], activation="relu")
    for _ in range(hidden_layers - 1):
        h = sage_conv(a_bf, inv_deg, h, params["conv"], activation="relu")
    out = sage_conv(a_bf, inv_deg, h, params["conv2"], activation="log_softmax")
    return out[:n, :params["conv2"]["f_out"]]


def reference_forward(params, x, edge_index, hidden_layers=1):
    """Dense pure-JAX reference with identical mean-aggregation semantics."""
    n = x.shape[0]
    src, dst = edge_index[0], edge_index[1]
    adj = jnp.zeros((n, n), jnp.float32).at[dst, src].add(1.0)
    deg = jnp.sum(adj, axis=1, keepdims=True)
    inv_deg = jnp.where(deg > 0.0, 1.0 / jnp.maximum(deg, 1.0), 0.0)

    def layer(h, p):
        agg = (adj @ h) * inv_deg
        return agg @ p["w_l"] + h @ p["w_r"] + p["b_l"]

    h = jax.nn.relu(layer(x, params["conv1"]))
    for _ in range(hidden_layers - 1):
        h = jax.nn.relu(layer(h, params["conv"]))
    return jax.nn.log_softmax(layer(h, params["conv2"]), axis=1)


if __name__ == "__main__":
    key = jax.random.PRNGKey(0)
    k_x, k_e, k_p = jax.random.split(key, 3)

    num_nodes, num_edges = 600, 3000
    in_channels, hidden_channels, out_channels = 32, 160, 16
    hidden_layers = 2

    x = jax.random.normal(k_x, (num_nodes, in_channels), jnp.float32)
    edge_index = jax.random.randint(k_e, (2, num_edges), 0, num_nodes, jnp.int32)
    params = init_graphsage(k_p, in_channels, hidden_channels, out_channels)

    # Graph preprocessing hoisted out of the forward pass, reused across layers/calls.
    a_bf, inv_deg = build_graph(edge_index, num_nodes)

    out = graphsage_forward(params, x, a_bf, inv_deg, hidden_layers=hidden_layers)
    out = jax.block_until_ready(out)

    assert out.shape == (num_nodes, out_channels)
    # log_softmax rows must (log-)normalize to ~0 over the valid lanes only
    assert jnp.allclose(jnp.sum(jnp.exp(out), axis=1), 1.0, atol=1e-4)
    # compare against the dense pure-JAX reference (bf16 aggregation -> loose tol)
    ref = reference_forward(params, x, edge_index, hidden_layers=hidden_layers)
    max_err = float(jnp.max(jnp.abs(out - ref)))
    assert max_err < 1e-1, max_err
    print("KERNEL_OK")
</pallas_src>

<mosaic_0001>
module attributes {stable_mosaic.version = 11 : i64} {
  func.func @_sage_tiled_kernel(%arg0: i32, %arg1: i32, %arg2: memref<256x256xbf16, #tpu.memory_space<vmem>>, %arg3: memref<256x128xbf16, #tpu.memory_space<vmem>>, %arg4: memref<256x128xf32, #tpu.memory_space<vmem>>, %arg5: memref<256x1xf32, #tpu.memory_space<vmem>>, %arg6: memref<128x256xf32, #tpu.memory_space<vmem>>, %arg7: memref<128x256xf32, #tpu.memory_space<vmem>>, %arg8: memref<1x256xf32, #tpu.memory_space<vmem>>, %arg9: memref<256x256xf32, #tpu.memory_space<vmem>>, %arg10: memref<256x128xf32, #tpu.memory_space<vmem>>) attributes {dimension_semantics = [#tpu.dimension_semantics<parallel>, #tpu.dimension_semantics<arbitrary>], iteration_bounds = array<i64: 3, 3>, scalar_prefetch = 0 : i64, scratch_operands = 1 : i64, tpu.core_type = #tpu.core_type<tc>, window_params = [{transform_indices = @transform_0, window_bounds = array<i64: 256, 256>}, {transform_indices = @transform_1, window_bounds = array<i64: 256, 128>}, {transform_indices = @transform_2, window_bounds = array<i64: 256, 128>}, {transform_indices = @transform_3, window_bounds = array<i64: 256, 1>}, {pipeline_mode = #tpu.pipeline_mode<synchronous>, transform_indices = @transform_4, window_bounds = array<i64: 128, 256>}, {pipeline_mode = #tpu.pipeline_mode<synchronous>, transform_indices = @transform_5, window_bounds = array<i64: 128, 256>}, {pipeline_mode = #tpu.pipeline_mode<synchronous>, transform_indices = @transform_6, window_bounds = array<i64: 1, 256>}, {transform_indices = @transform_7, window_bounds = array<i64: 256, 256>}]} {
    %c0_i32 = arith.constant 0 : i32
    %0 = arith.cmpi eq, %arg1, %c0_i32 : i32
    %1 = arith.extui %0 : i1 to i32
    %c0_i32_0 = arith.constant 0 : i32
    %2 = arith.cmpi ne, %1, %c0_i32_0 : i32
    scf.if %2 {
      %cst_9 = arith.constant 0.000000e+00 : f32
      %12 = vector.broadcast %cst_9 : f32 to vector<256x128xf32>
      %c0_10 = arith.constant 0 : index
      %c0_11 = arith.constant 0 : index
      %13 = vector.load %arg10[%c0_10, %c0_11] : memref<256x128xf32, #tpu.memory_space<vmem>>, vector<256x128xf32>
      tpu.vector_store %arg10[%c0_10, %c0_11], %12 {strides = array<i32>} : memref<256x128xf32, #tpu.memory_space<vmem>>, vector<256x128xf32>,
    } else {
    }
    %c0 = arith.constant 0 : index
    %c0_1 = arith.constant 0 : index
    %3 = vector.load %arg10[%c0, %c0_1] : memref<256x128xf32, #tpu.memory_space<vmem>>, vector<256x128xf32>
    %c0_2 = arith.constant 0 : index
    %c0_3 = arith.constant 0 : index
    %4 = vector.load %arg2[%c0_2, %c0_3] : memref<256x256xbf16, #tpu.memory_space<vmem>>, vector<256x256xbf16>
    %c0_4 = arith.constant 0 : index
    %c0_5 = arith.constant 0 : index
    %5 = vector.load %arg3[%c0_4, %c0_5] : memref<256x128xbf16, #tpu.memory_space<vmem>>, vector<256x128xbf16>
    %cst = arith.constant dense<0.000000e+00> : vector<256x128xf32>
    %6 = tpu.matmul %4, %5, %cst {dimension_numbers = #tpu.dot_dimension_numbers<[1], [0], [0], [1], [0, 0, 1, 1], [], []>} : vector<256x256xbf16>, vector<256x128xbf16>, vector<256x128xf32> -> vector<256x128xf32>
    %7 = arith.addf %3, %6 : vector<256x128xf32>
    %c0_6 = arith.constant 0 : index
    %c0_7 = arith.constant 0 : index
    %8 = vector.load %arg10[%c0_6, %c0_7] : memref<256x128xf32, #tpu.memory_space<vmem>>, vector<256x128xf32>
    tpu.vector_store %arg10[%c0_6, %c0_7], %7 {strides = array<i32>} : memref<256x128xf32, #tpu.memory_space<vmem>>, vector<256x128xf32>,
    %c2_i32 = arith.constant 2 : i32
    %9 = arith.cmpi eq, %arg1, %c2_i32 : i32
    %10 = arith.extui %9 : i1 to i32
    %c0_i32_8 = arith.constant 0 : i32
    %11 = arith.cmpi ne, %10, %c0_i32_8 : i32
    scf.if %11 {
      %c0_9 = arith.constant 0 : index
      %c0_10 = arith.constant 0 : index
      %12 = vector.load %arg10[%c0_9, %c0_10] : memref<256x128xf32, #tpu.memory_space<vmem>>, vector<256x128xf32>
      %c0_11 = arith.constant 0 : index
      %c0_12 = arith.constant 0 : index
      %13 = vector.load %arg5[%c0_11, %c0_12] : memref<256x1xf32, #tpu.memory_space<vmem>>, vector<256x1xf32>
      %14 = vector.broadcast %13 : vector<256x1xf32> to vector<256x128xf32>
      %15 = arith.mulf %12, %14 : vector<256x128xf32>
      %c0_13 = arith.constant 0 : index
      %c0_14 = arith.constant 0 : index
      %16 = vector.load %arg6[%c0_13, %c0_14] : memref<128x256xf32, #tpu.memory_space<vmem>>, vector<128x256xf32>
      %cst_15 = arith.constant dense<0.000000e+00> : vector<256x256xf32>
      %17 = tpu.matmul %15, %16, %cst_15 {dimension_numbers = #tpu.dot_dimension_numbers<[1], [0], [0], [1], [0, 0, 1, 1], [], []>} : vector<256x128xf32>, vector<128x256xf32>, vector<256x256xf32> -> vector<256x256xf32>
      %c0_16 = arith.constant 0 : index
      %c0_17 = arith.constant 0 : index
      %18 = vector.load %arg4[%c0_16, %c0_17] : memref<256x128xf32, #tpu.memory_space<vmem>>, vector<256x128xf32>
      %c0_18 = arith.constant 0 : index
      %c0_19 = arith.constant 0 : index
      %19 = vector.load %arg7[%c0_18, %c0_19] : memref<128x256xf32, #tpu.memory_space<vmem>>, vector<128x256xf32>
      %cst_20 = arith.constant dense<0.000000e+00> : vector<256x256xf32>
      %20 = tpu.matmul %18, %19, %cst_20 {dimension_numbers = #tpu.dot_dimension_numbers<[1], [0], [0], [1], [0, 0, 1, 1], [], []>} : vector<256x128xf32>, vector<128x256xf32>, vector<256x256xf32> -> vector<256x256xf32>
      %21 = arith.addf %17, %20 : vector<256x256xf32>
      %c0_21 = arith.constant 0 : index
      %c0_22 = arith.constant 0 : index
      %22 = vector.load %arg8[%c0_21, %c0_22] : memref<1x256xf32, #tpu.memory_space<vmem>>, vector<1x256xf32>
      %23 = vector.broadcast %22 : vector<1x256xf32> to vector<256x256xf32>
      %24 = arith.addf %21, %23 : vector<256x256xf32>
      %cst_23 = arith.constant 0.000000e+00 : f32
      %25 = vector.broadcast %cst_23 : f32 to vector<256x256xf32>
      %26 = arith.maximumf %24, %25 : vector<256x256xf32>
      %c0_24 = arith.constant 0 : index
      %c0_25 = arith.constant 0 : index
      %27 = vector.load %arg9[%c0_24, %c0_25] : memref<256x256xf32, #tpu.memory_space<vmem>>, vector<256x256xf32>
      tpu.vector_store %arg9[%c0_24, %c0_25], %26 {strides = array<i32>} : memref<256x256xf32, #tpu.memory_space<vmem>>, vector<256x256xf32>,
    } else {
    }
    return
  }
  func.func @transform_0(%arg0: i32, %arg1: i32) -> (i32, i32) {
    %c0_i32 = arith.constant 0 : i32
    return %arg0, %arg1 : i32, i32
  }
  func.func @transform_1(%arg0: i32, %arg1: i32) -> (i32, i32) {
    %c0_i32 = arith.constant 0 : i32
    %c0_i32_0 = arith.constant 0 : i32
    return %arg1, %c0_i32 : i32, i32
  }
  func.func @transform_2(%arg0: i32, %arg1: i32) -> (i32, i32) {
    %c0_i32 = arith.constant 0 : i32
    %c0_i32_0 = arith.constant 0 : i32
    return %arg0, %c0_i32 : i32, i32
  }
  func.func @transform_3(%arg0: i32, %arg1: i32) -> (i32, i32) {
    %c0_i32 = arith.constant 0 : i32
    %c0_i32_0 = arith.constant 0 : i32
    return %arg0, %c0_i32 : i32, i32
  }
  func.func @transform_4(%arg0: i32, %arg1: i32) -> (i32, i32) {
    %c0_i32 = arith.constant 0 : i32
    %c0_i32_0 = arith.constant 0 : i32
    %c0_i32_1 = arith.constant 0 : i32
    return %c0_i32, %c0_i32_0 : i32, i32
  }
  func.func @transform_5(%arg0: i32, %arg1: i32) -> (i32, i32) {
    %c0_i32 = arith.constant 0 : i32
    %c0_i32_0 = arith.constant 0 : i32
    %c0_i32_1 = arith.constant 0 : i32
    return %c0_i32, %c0_i32_0 : i32, i32
  }
  func.func @transform_6(%arg0: i32, %arg1: i32) -> (i32, i32) {
    %c0_i32 = arith.constant 0 : i32
    %c0_i32_0 = arith.constant 0 : i32
    %c0_i32_1 = arith.constant 0 : i32
    return %c0_i32, %c0_i32_0 : i32, i32
  }
  func.func @transform_7(%arg0: i32, %arg1: i32) -> (i32, i32) {
    %c0_i32 = arith.constant 0 : i32
    %c0_i32_0 = arith.constant 0 : i32
    return %arg0, %c0_i32 : i32, i32
  }
}

</mosaic_0001>

<bundles_post_ra>
// kernel: tpu_custom_call.1
= control target key start
LH: loop header
LB: loop body
LE: loop exit
PB: predicated region body
PF: predicated region fallthrough
CT: control target
= control target key end

     0   :  { %s3879_s0 = inlined_call_operand.hbm [shape: bf16[768,768], index: 0, kind: input, shape index: {}]   ;;  %s3880_s1 = inlined_call_operand.hbm [shape: bf16[768,128], index: 1, kind: input, shape index: {}]   ;;  %s3881_s2 = inlined_call_operand.hbm [shape: f32[768,128], index: 2, kind: input, shape index: {}]   ;;  %s3882_s3 = inlined_call_operand.vmem [shape: f32[768,1], index: 3, kind: input, shape index: {}]   ;;  %s3883_s4 = inlined_call_operand.hbm [shape: f32[128,256], index: 4, kind: input, shape index: {}]   ;;  %s3884_s5 = inlined_call_operand.hbm [shape: f32[128,256], index: 5, kind: input, shape index: {}]   ;;  %s3885_s6 = inlined_call_operand.hbm [shape: f32[1,256], index: 6, kind: input, shape index: {}]   ;;  %s3886_s7 = inlined_call_operand.hbm [shape: f32[768,256], index: 7, kind: output, shape index: {}]  }
   0x1   :  { %3897 = sst [smem:[#allocation32_spill]] %s3879_s0 }
   0x2   :  { %3898 = sst [smem:[#allocation33_spill]] %s3880_s1 }
   0x3   :  { %3899 = sst [smem:[#allocation34_spill]] %s3881_s2 }
   0x4   :  { %3900 = sst [smem:[#allocation35_spill]] %s3882_s3 }
   0x5   :  { %3901 = sst [smem:[#allocation36_spill]] %s3883_s4 }
   0x6   :  { %3902 = sst [smem:[#allocation37_spill]] %s3884_s5 }
   0x7   :  { %3903 = sst [smem:[#allocation38_spill]] %s3885_s6 }
   0x8   :  { %3904 = sst [smem:[#allocation39_spill]] %s3886_s7 }
   0x9   :  { %12 = vsyncpa [#allocation4], 0 }
   0xa   :  { %14 = vsyncpa [#allocation4 + $0x1], 0 }
   0xb   :  { %15 = vsyncpa [#allocation7], 0 }
   0xc   :  { %17 = vsyncpa [#allocation7 + $0x1], 0 }
   0xd   :  { %18 = vsyncpa [#allocation10], 0 }
   0xe   :  { %19 = vsyncpa [#allocation13], 0 }
   0xf   :  { %20 = vsyncpa [#allocation5], 0 }
  0x10   :  { %22 = vsyncpa [#allocation5 + $0x1], 0  ;;  %s3172_s24 = smov 0   ;;  %s3174_s25 = smov 0  }
  0x11   :  { %s3176_s26 = smov 0   ;;  %s3178_s27 = smov 0  }
  0x12   :  { %s3180_s28 = smov 0   ;;  %s3182_s29 = smov 0  }
  0x13   :  { %s3184_s30 = smov 0   ;;  %s3186_s8 = smov 0  }
  0x14   :  { %s3188_s9 = smov 0   ;;  %s3190_s10 = smov 0  }
  0x15   :  { %s3192_s11 = smov 0   ;;  %s3194_s12 = smov 0  }
  0x16   :  { %s3196_s13 = smov 0   ;;  %s3198_s14 = smov 0  }
  0x17 LB: > { %3905 = sst [smem:[#allocation21_spill]] %s3080_s28  ;;  %s3243_s15 = sadd.s32 4294967295, %s3116_s14   ;;  %s3116_s14 = sphi %s3198_s14, %s28_s14   ;;  %s3112_s13 = sphi %s3196_s13, %s3950_s13   ;;  %s3108_s12 = sphi %s3194_s12, %s3949_s12   ;;  %s3104_s11 = sphi %s3192_s11, %s3948_s11   ;;  %s3100_s10 = sphi %s3190_s10, %s3947_s10   ;;  %s3096_s9 = sphi %s3188_s9, %s3958_s9   ;;  %s3092_s8 = sphi %s3186_s8, %s3957_s8   ;;  %s3088_s30 = sphi %s3184_s30, %s3956_s30   ;;  %s3084_s29 = sphi %s3182_s29, %s3945_s29   ;;  %s3080_s28 = sphi %s3180_s28, %s3944_s28   ;;  %s3076_s27 = sphi %s3178_s27, %s3955_s27   ;;  %s3072_s26 = sphi %s3176_s26, %s3954_s26   ;;  %s3068_s25 = sphi %s3174_s25, %s3953_s25   ;;  %s3064_s24 = sphi %s3172_s24, %s3952_s24  }
  0x18   : > { %3906 = sst [smem:[#allocation22_spill]] %s3084_s29  ;;  %p2298_p0 = scmp.ge.s32.totalorder %s3116_s14, 1 }
  0x19   : > { %3907 = sst [smem:[#allocation23_spill]] %s3100_s10  ;;  %p63_p1 = scmp.eq.s32.totalorder %s3243_s15, 0 }
  0x1a   : > { %3908 = sst [smem:[#allocation24_spill]] %s3104_s11  ;;  %p227_p2 = scmp.eq.s32.totalorder %s3243_s15, 8 }
  0x1b   : > { %3909 = sst [smem:[#allocation25_spill]] %s3108_s12  ;;  %p240_p3 = scmp.lt.s32.totalorder %s3116_s14, 10 }
  0x1c   : > { %3910 = sst [smem:[#allocation26_spill]] %s3112_s13  ;;  %s3118_s20 = smov [#allocation9]  }
  0x1d   : > { %s3911_s4 = sld [smem:[#allocation36_spill]]  ;;  %p3252_p4 = pnand %p2298_p0, %p240_p3 }
  0x1e   : > { %s253_s21 = sshll.u32 %s3118_s20, 4  ;;  %s3888_s23 = smov 256   ;;  %s254_s21 = int_to_ptr.vmem [resolvable:$true] %s253_s21 }
  0x1f   : > { %s3912_s19 = scalar_select %p3252_p4, 1, 0 }
  0x20   : > { %p2613_p5 = pneg %p3252_p4  ;;  %s3889_s16 = smov 16  }
  0x21   : > { %3913 = sst [smem:[#allocation27_spill]] %s3912_s19  ;;  %s37_s17 = sadd.s32 1, %s3108_s12 }
  0x22   : > { %p3260_p6 = pnand %p2613_p5, %p63_p1  ;;  %s40_s20 = sadd.s32 1, %s3112_s13 }
  0x23   : > { %s251_s18 = sshll.u32 %s3911_s4, 4  ;;  %p38_p7 = scmp.ge.s32.totalorder %s37_s17, 3  ;;  %s252_s18 = int_to_ptr.hbm [resolvable:$true] %s251_s18 }
  0x24   : > { %2616 = dma.hbm_to_vmem [thread:$0]  (!%p3260_p6), %s252_s18, 4096, %s254_s21, [#allocation10], %s3888_s23, %s3888_s23, %s3889_s16  }
  0x25   : > { %p57_p8 = scmp.eq.s32.totalorder %s3116_s14, 0  ;;  %s75_s4 = sadd.s32 1, %s3084_s29 }
  0x26   : > { %p82_p9 = scmp.ne.s32.totalorder %s3084_s29, %s3080_s28  ;;  %s3960_s17 = smov (%p38_p7, %s37_s17), 0 }
  0x27   : > { %3915 = sst [smem:[#allocation28_spill]] %s3960_s17  ;;  %s3962_s20 = smov (!%p38_p7, %s40_s20), %s3112_s13 }
  0x28   : > { %s45_s7 = ssub.s32 %s3108_s12, %s3960_s17  ;;  %p3282_p10 = por %p82_p9, %p57_p8 }
  0x29   : > { %p42_p11 = scmp.ge.s32.totalorder %s3962_s20, 3  ;;  %p73_p12 = scmp.eq.s32.totalorder %s45_s7, 0 }
  0x2a   : > { %p88_p13 = scmp.ne.s32.totalorder %s3080_s28, %s3076_s27  ;;  %p2640_p0 = scmp.lt.s32.totalorder %s3116_s14, 9 }
  0x2b   : > { %s3964_s20 = smov (%p42_p11, %s3962_s20), 0  ;;  %s318_s10 = sand.u32 1, %s3116_s14  }
  0x2c   : > { %3917 = sst [smem:[#allocation29_spill]] %s3964_s20  ;;  %s3296_s23 = ssub.s32 %s3112_s13, %s3964_s20 }
  0x2d   : > { %s3292_s21 = scalar_select %p73_p12, %s3084_s29, %s75_s4  }
  0x2e   : > { %p3300_p3 = por %p88_p13, %p63_p1  ;;  %s46_s17 = sor.u32 %s45_s7, %s3296_s23 }
  0x2f   : > { %3918 = sst [smem:[#allocation30_spill]] %s3292_s21  ;;  %p99_p5 = scmp.eq.s32.totalorder %s3296_s23, 0 }
  0x30   : > { %p3306_p7 = scmp.eq.s32.totalorder %s46_s17, 0  ;;  %s320_s4 = sand.u32 1, %s3084_s29  }
  0x31   : > { %s2308_s21 = sshll.u32 %s320_s4, 7  ;;  %s2524_s3 = sshll.u32 %s3108_s12, 7 }
  0x32   : > { %s3921_s1 = sld [smem:[#allocation33_spill]]  ;;  %s322_s2 = scalar_lea.vmem [#allocation6], %s2308_s21 }
  0x33   : > { %s330_s0 = sshll.u32 %s322_s2, 4  ;;  %p2627_p9 = pnand %p2640_p0, %p3282_p10  ;;  %s331_s0 = int_to_ptr.vmem [resolvable:$true] %s330_s0 }
  0x34   : > { %s3922_s5 = sld [smem:[#allocation37_spill]]  ;;  %s3323_s11 = scalar_lea.sflag [#allocation7], %s318_s10 }
  0x35   : > { %s3121_s2 = smov 64   ;;  %s3923_s6 = sld [smem:[#allocation38_spill]] }
  0x36   : > { %s3123_s21 = smov [#allocation11]   ;;  %s3924_s10 = smov 16  }
  0x37   : > { %s267_s4 = sshll.u32 %s3123_s21, 4  ;;  %s3925_s7 = smov 256   ;;  %s268_s4 = int_to_ptr.vmem [resolvable:$true] %s267_s4 }
  0x38   : > { %s327_s28 = scalar_lea.hbm %s3921_s1, %s2524_s3  ;;  %s3122_s3 = smov 4  }
  0x39   : > { %s328_s19 = sshll.u32 %s327_s28, 4  ;;  %s3124_s17 = smov [#allocation12]   ;;  %s329_s19 = int_to_ptr.hbm [resolvable:$true] %s328_s19 }
  0x3a   : > { %s265_s29 = sshll.u32 %s3922_s5, 4  ;;  %p56_p10 = scmp.ne.s32.totalorder %s3096_s9, %s3092_s8  ;;  %s266_s29 = int_to_ptr.hbm [resolvable:$true] %s265_s29 }
  0x3b   : > { %2629 = dma.hbm_to_vmem [thread:$0]  (!%p2627_p9), %s329_s19, 2048, %s331_s0, %s3323_s11, %s3121_s2, %s3121_s2, %s3122_s3  }
  0x3c   : > { %s280_s18 = sshll.u32 %s3923_s6, 4  ;;  %s282_s0 = sshll.u32 %s3124_s17, 4  ;;  %s281_s18 = int_to_ptr.hbm [resolvable:$true] %s280_s18  ;;  %s283_s0 = int_to_ptr.vmem [resolvable:$true] %s282_s0 }
  0x3d   : > { %2619 = dma.hbm_to_vmem [thread:$0]  (!%p3260_p6), %s266_s29, 4096, %s268_s4, [#allocation10], %s3925_s7, %s3925_s7, %s3924_s10  }
  0x3e   : > { %2622 = dma.hbm_to_vmem [thread:$0]  (!%p3260_p6), %s281_s18, 32, %s283_s0, [#allocation13]  }
  0x3f   : > { %s49_s19 = sadd.s32 1, %s3096_s9  ;;  %p58_p11 = por %p57_p8, %p56_p10 }
  0x40   : > { %s3342_s2 = scalar_select %p3306_p7, %s3096_s9, %s49_s19  }
  0x41   : > { %p62_p12 = scmp.ne.s32.totalorder %s3092_s8, %s3088_s30  ;;  %s293_s3 = sand.u32 1, %s3096_s9  }
  0x42   : > { %3926 = sst [smem:[#allocation31_spill]] %s3342_s2  ;;  %s2305_s28 = sshll.u32 %s3108_s12, 1 }
  0x43   : > { %p3352_p13 = por %p63_p1, %p62_p12  ;;  %s2303_s29 = sshll.u32 %s293_s3, 8 }
  0x44   : > { %s2592_s21 = smul.u32 192, %s3112_s13  ;;  %p2624_p6 = pnand %p2640_p0, %p58_p11 }
  0x45   : > { %s297_s27 = scalar_lea.vmem [#allocation3], %s2303_s29  ;;  %s3928_s7 = sld [smem:[#allocation32_spill]] }
  0x46   : > { %s303_s22 = sadd.s32 %s2592_s21, %s2305_s28  ;;  %s308_s30 = sshll.u32 %s297_s27, 4  ;;  %s309_s30 = int_to_ptr.vmem [resolvable:$true] %s308_s30 }
  0x47   : > { %s2307_s18 = sshll.u32 %s303_s22, 2  ;;  %s294_s19 = scalar_lea.sflag [#allocation4], %s293_s3 }
  0x48   : > { %s3125_s28 = smov 384   ;;  %s3126_s21 = smov 128  }
  0x49   : > { %s3127_s29 = smov 8   ;;  %s2297_s27 = sadd.s32 4294967294, %s3116_s14  }
  0x4a   : > { %s101_s1 = sadd.s32 1, %s3072_s26  ;;  %p108_p7 = scmp.ne.s32.totalorder %s3072_s26, %s3068_s25 }
  0x4b   : > { %s305_s17 = scalar_lea.hbm %s3928_s7, %s2307_s18  ;;  %p114_p10 = scmp.ne.s32.totalorder %s3068_s25, %s3064_s24 }
  0x4c   : > { %s306_s0 = sshll.u32 %s305_s17, 4  ;;  %p3373_p9 = por %p108_p7, %p57_p8  ;;  %s307_s0 = int_to_ptr.hbm [resolvable:$true] %s306_s0 }
  0x4d   : > { %2626 = dma.hbm_to_vmem [thread:$0]  (!%p2624_p6), %s307_s0, 4096, %s309_s30, %s294_s19, %s3125_s28, %s3126_s21, %s3127_s29  }
  0x4e   : > { %s3369_s22 = scalar_select %p99_p5, %s3072_s26, %s101_s1  }
  0x4f   : > { %p3381_p11 = por %p227_p2, %p108_p7  ;;  %p233_p12 = scmp.eq.s32.totalorder %s2297_s27, 8 }
  0x50   : > { %p3387_p6 = por %p114_p10, %p63_p1  ;;  %s342_s1 = sand.u32 1, %s3072_s26  }
  0x51   : > { %p3392_p5 = por %p233_p12, %p114_p10  ;;  %s2311_s4 = sshll.u32 %s342_s1, 8 }
  0x52   : > { %s2525_s10 = sshll.u32 %s3112_s13, 8  ;;  %s3933_s0 = sld [smem:[#allocation34_spill]] }
  0x53   : > { %s344_s28 = scalar_lea.vmem [#allocation8], %s2311_s4  ;;  %p2630_p2 = pnand %p2640_p0, %p3373_p9 }
  0x54   : > { %s352_s5 = sshll.u32 %s344_s28, 4  ;;  %s375_s1 = sand.u32 (!%p3252_p4), 1, %s3092_s8   ;;  %s353_s5 = int_to_ptr.vmem [resolvable:$true] %s352_s5 }
  0x55   : > { %s2315_s13 = sshll.u32 (!%p3252_p4), %s375_s1, 8  ;;  %s376_s12 = scalar_lea.sflag (!%p3252_p4), [#allocation4], %s375_s1 }
  0x56   : > { %373 = sbr.rel (%p3252_p4) target bundleno = 978 (0x3d2), region = 48  ;;  %s3408_s2 = scalar_lea.vmem (!%p3252_p4), [#allocation3], %s2315_s13 }
  0x58   : > { %s349_s19 = scalar_lea.hbm %s3933_s0, %s2525_s10 }
  0x59   : > { %s350_s6 = sshll.u32 %s349_s19, 4  ;;  %s351_s6 = int_to_ptr.hbm [resolvable:$true] %s350_s6 }
  0x5a   : > { %2632 = dma.hbm_to_vmem [thread:$0]  (!%p2630_p2), %s351_s6, 4096, %s353_s5, %s3323_s11, %s3126_s21, %s3126_s21, %s3127_s29  }
  0x5b   : > { %3039 = dma.done.wait (%p3352_p13), %s376_s12, 4096  }
  0x5c   : > { %3041 = vsyncadd (%p3352_p13), %s376_s12, 4294963200  ;;  %s3935_s18 = sld [smem:[#allocation21_spill]]  ;;  %s385_s4 = sand.u32 1, %s3243_s15  }
  0x5d   : > { %s386_s11 = scalar_lea.sflag [#allocation7], %s385_s4 }
  0x62   : > { %s387_s5 = sand.u32 1, %s3935_s18  }
  0x63   : > { %s2316_s6 = sshll.u32 %s387_s5, 7 }
  0x64   : > { %s3416_s21 = scalar_lea.vmem [#allocation6], %s2316_s6 }
  0x65   : > { %3043 = dma.done.wait (%p3300_p3), %s386_s11, 2048  }
  0x66   : > { %3045 = vsyncadd (%p3300_p3), %s386_s11, 4294965248  ;;  %s3423_s13 = sand.u32 1, %s3068_s25  }
  0x67   : > { %s2317_s12 = sshll.u32 %s3423_s13, 8 }
  0x68   : > { %s3426_s20 = scalar_lea.vmem [#allocation8], %s2317_s12 }
  0x69   : > { %3047 = dma.done.wait (%p3387_p6), %s386_s11, 4096  }
  0x6a   : > { %3049 = vsyncadd (%p3387_p6), %s386_s11, 4294963200 }
  0x6b   : > { %3051 = dma.done.wait (%p63_p1), [#allocation10], 8192  }
  0x6c   : > { %3053 = vsyncadd (%p63_p1), [#allocation10], 4294959104 }
  0x6d   : > { %3055 = dma.done.wait (%p63_p1), [#allocation13], 32  }
  0x6e   : > { %3057 = vsyncadd (%p63_p1), [#allocation13], 4294967264  ;;  %s3936_s16 = sld [smem:[#allocation24_spill]]  ;;  %s2321_s29 = sshll.u32 %s3423_s13, 9 }
  0x6f   : > { %s3937_s0 = sld [smem:[#allocation35_spill]]  ;;  %s3447_s28 = scalar_lea.vmem [#allocation14], %s2321_s29 }
  0x70   : > { %s3938_s27 = sld [smem:[#allocation23_spill]] }
  0x74   : > { %s2322_s10 = sshll.u32 %s3936_s16, 5 }
  0x75   : > { %p466_p4 = scmp.lt.s32.totalorder %s2322_s10, 95 }
  0x76   : > { %p2324_p8 = scmp.ne.s32.totalorder %s3938_s27, 0 }
  0x77   : > { %s3966_s10 = smov (!%p466_p4, %s2322_s10), 95 }
  0x78   : > { %s2323_s23 = sshll.u32 %s3966_s10, 3  ;;  %475 = sbr.rel (%p2324_p8) target bundleno = 158 (0x9e), region = 76 }
  0x79   : > { %s3445_s19 = scalar_lea.vmem %s3937_s0, %s2323_s23 }
  0x7d   : > { %v3128_v0 = vmov 0.0  }
  0x7e   : > { %476 = vst [vmem:[#allocation2 + $0xb0] sm:$0xff] %v3128_v0 }
  0x7f   : > { %477 = vst [vmem:[#allocation2] sm:$0xff] %v3128_v0 }
  0x80   : > { %478 = vst [vmem:[#allocation2 + $0xd8] sm:$0xff] %v3128_v0 }
  0x81   : > { %479 = vst [vmem:[#allocation2 + $0x18] sm:$0xff] %v3128_v0 }
  0x82   : > { %480 = vst [vmem:[#allocation2 + $0x50] sm:$0xff] %v3128_v0 }
  0x83   : > { %481 = vst [vmem:[#allocation2 + $0x68] sm:$0xff] %v3128_v0 }
  0x84   : > { %482 = vst [vmem:[#allocation2 + $0x30] sm:$0xff] %v3128_v0 }
  0x85   : > { %483 = vst [vmem:[#allocation2 + $0x48] sm:$0xff] %v3128_v0 }
  0x86   : > { %484 = vst [vmem:[#allocation2 + $0x80] sm:$0xff] %v3128_v0 }
  0x87   : > { %485 = vst [vmem:[#allocation2 + $0x88] sm:$0xff] %v3128_v0 }
  0x88   : > { %486 = vst [vmem:[#allocation2 + $0xe8] sm:$0xff] %v3128_v0 }
  0x89   : > { %487 = vst [vmem:[#allocation2 + $0xb8] sm:$0xff] %v3128_v0 }
  0x8a   : > { %488 = vst [vmem:[#allocation2 + $0x60] sm:$0xff] %v3128_v0 }
  0x8b   : > { %489 = vst [vmem:[#allocation2 + $0xf0] sm:$0xff] %v3128_v0 }
  0x8c   : > { %490 = vst [vmem:[#allocation2 + $0x8] sm:$0xff] %v3128_v0 }
  0x8d   : > { %491 = vst [vmem:[#allocation2 + $0x78] sm:$0xff] %v3128_v0 }
  0x8e   : > { %492 = vst [vmem:[#allocation2 + $0x38] sm:$0xff] %v3128_v0 }
  0x8f   : > { %493 = vst [vmem:[#allocation2 + $0x58] sm:$0xff] %v3128_v0 }
  0x90   : > { %494 = vst [vmem:[#allocation2 + $0x40] sm:$0xff] %v3128_v0 }
  0x91   : > { %495 = vst [vmem:[#allocation2 + $0xc8] sm:$0xff] %v3128_v0 }
  0x92   : > { %496 = vst [vmem:[#allocation2 + $0xe0] sm:$0xff] %v3128_v0 }
  0x93   : > { %497 = vst [vmem:[#allocation2 + $0x90] sm:$0xff] %v3128_v0 }
  0x94   : > { %498 = vst [vmem:[#allocation2 + $0x70] sm:$0xff] %v3128_v0 }
  0x95   : > { %499 = vst [vmem:[#allocation2 + $0xc0] sm:$0xff] %v3128_v0 }
  0x96   : > { %500 = vst [vmem:[#allocation2 + $0xa8] sm:$0xff] %v3128_v0 }
  0x97   : > { %501 = vst [vmem:[#allocation2 + $0xd0] sm:$0xff] %v3128_v0 }
  0x98   : > { %502 = vst [vmem:[#allocation2 + $0x10] sm:$0xff] %v3128_v0 }
  0x99   : > { %503 = vst [vmem:[#allocation2 + $0x28] sm:$0xff] %v3128_v0 }
  0x9a   : > { %504 = vst [vmem:[#allocation2 + $0xa0] sm:$0xff] %v3128_v0 }
  0x9b   : > { %505 = vst [vmem:[#allocation2 + $0xf8] sm:$0xff] %v3128_v0 }
  0x9c   : > { %506 = vst [vmem:[#allocation2 + $0x20] sm:$0xff] %v3128_v0 }
  0x9d   : > { %507 = vst [vmem:[#allocation2 + $0x98] sm:$0xff] %v3128_v0 }
  0x9e PF: > { %v2565_v1 = vld [vmem:[%s3416_s21 + $0x38] sm:$0xff]  ;;  %v2564_v3 = vld [vmem:[%s3416_s21 + $0x30] sm:$0xff]  ;;  %v2563_v5 = vld [vmem:[%s3416_s21 + $0x28] sm:$0xff]  ;;  %s3939_s15 = sld [smem:[#allocation23_spill]] }
  0x9f   : > { %v2573_v2 = vld [vmem:[%s3416_s21 + $0x78] sm:$0xff]  ;;  %860 = vmatpush.bf16.msra.mxu0 %v2565_v1  ;;  %2576 = vmatpush.bf16.msra.mxu2 %v2565_v1  ;;  %v2572_v4 = vld [vmem:[%s3416_s21 + $0x70] sm:$0xff]  ;;  %v2571_v6 = vld [vmem:[%s3416_s21 + $0x68] sm:$0xff] }
  0xa0   : > { %949 = vmatpush.bf16.msra.mxu1 %v2573_v2  ;;  %2584 = vmatpush.bf16.msra.mxu3 %v2573_v2  ;;  %v2562_v7 = vld [vmem:[%s3416_s21 + $0x20] sm:$0xff]  ;;  %v2561_v9 = vld [vmem:[%s3416_s21 + $0x18] sm:$0xff]  ;;  %v2560_v11 = vld [vmem:[%s3416_s21 + $0x10] sm:$0xff] }
  0xa1   : > { %v2570_v8 = vld [vmem:[%s3416_s21 + $0x60] sm:$0xff]  ;;  %v2569_v10 = vld [vmem:[%s3416_s21 + $0x58] sm:$0xff]  ;;  %v2568_v12 = vld [vmem:[%s3416_s21 + $0x50] sm:$0xff] }
  0xa2   : > { %v2559_v13 = vld [vmem:[%s3416_s21 + $0x8] sm:$0xff]  ;;  %v2558_v15 = vld [vmem:[%s3416_s21] sm:$0xff]  ;;  %v2335_v29 = vld [vmem:[%s3408_s2 + $0x10] sm:$0xf] }
  0xa3   : > { %861 = vmatpush.bf16.msra.mxu0 %v2564_v3  ;;  %2577 = vmatpush.bf16.msra.mxu2 %v2564_v3  ;;  %v2567_v14 = vld [vmem:[%s3416_s21 + $0x48] sm:$0xff]  ;;  %v2566_v16 = vld [vmem:[%s3416_s21 + $0x40] sm:$0xff]  ;;  %v2529_v30 = vld [vmem:[%s3408_s2 + $0x14] sm:$0xf0] }
  0xa4   : > { %950 = vmatpush.bf16.msra.mxu1 %v2572_v4  ;;  %2585 = vmatpush.bf16.msra.mxu3 %v2572_v4  ;;  %v2327_v17 = vld [vmem:[%s3408_s2] sm:$0xf]  ;;  %v2527_v18 = vld [vmem:[%s3408_s2 + $0x4] sm:$0xf0]  ;;  %v2526_v21 = vld [vmem:[%s3408_s2 + $0x4] sm:$0xf]  ;;  %v2336_v37 = vor.u32 %v2529_v30, %v2335_v29 }
  0xa5   : > { %v2391_v19 = vld [vmem:[%s3408_s2 + $0x80] sm:$0xf]  ;;  %v2543_v20 = vld [vmem:[%s3408_s2 + $0x84] sm:$0xf0]  ;;  %v2329_v22 = vld [vmem:[%s3408_s2 + $0x8] sm:$0xf0]  ;;  %v2328_v25 = vor.u32 %v2527_v18, %v2327_v17 }
  0xa6   : > { %v2542_v23 = vld [vmem:[%s3408_s2 + $0x84] sm:$0xf]  ;;  %v2393_v24 = vld [vmem:[%s3408_s2 + $0x88] sm:$0xf0]  ;;  %v2392_v26 = vor.u32 %v2543_v20, %v2391_v19  ;;  %v2332_v27 = vor.u32 %v2526_v21, %v2329_v22  ;;  %v2399_v31 = vld [vmem:[%s3408_s2 + $0x90] sm:$0xf] }
  0xa7   : > { %862 = vmatpush.bf16.msra.mxu0 %v2563_v5  ;;  %2578 = vmatpush.bf16.msra.mxu2 %v2563_v5  ;;  %v2396_v28 = vor.u32 %v2542_v23, %v2393_v24  ;;  %v2545_v32 = vld [vmem:[%s3408_s2 + $0x94] sm:$0xf0]  ;;  %v2528_v33 = vld [vmem:[%s3408_s2 + $0x14] sm:$0xf]  ;;  %v2337_v34 = vld [vmem:[%s3408_s2 + $0x18] sm:$0xf0] }
  0xa8   : > { %951 = vmatpush.bf16.msra.mxu1 %v2571_v6  ;;  %2586 = vmatpush.bf16.msra.mxu3 %v2571_v6  ;;  %v2544_v35 = vld [vmem:[%s3408_s2 + $0x94] sm:$0xf]  ;;  %v2401_v36 = vld [vmem:[%s3408_s2 + $0x98] sm:$0xf0]  ;;  %v2400_v38 = vor.u32 %v2545_v32, %v2399_v31  ;;  %v2340_v39 = vor.u32 %v2528_v33, %v2337_v34  ;;  %v2343_v41 = vld [vmem:[%s3408_s2 + $0x20] sm:$0xf] }
  0xa9   : > { %v2404_v40 = vor.u32 %v2544_v35, %v2401_v36  ;;  %v2531_v42 = vld [vmem:[%s3408_s2 + $0x24] sm:$0xf0]  ;;  %v2407_v43 = vld [vmem:[%s3408_s2 + $0xa0] sm:$0xf]  ;;  %v2530_v45 = vld [vmem:[%s3408_s2 + $0x24] sm:$0xf] }
  0xaa   : > { %v2547_v44 = vld [vmem:[%s3408_s2 + $0xa4] sm:$0xf0]  ;;  %v2345_v46 = vld [vmem:[%s3408_s2 + $0x28] sm:$0xf0]  ;;  %v2546_v47 = vld [vmem:[%s3408_s2 + $0xa4] sm:$0xf]  ;;  %v2344_v49 = vor.u32 %v2531_v42, %v2343_v41 }
  0xab   : > { %863 = vmatpush.bf16.msra.mxu0 %v2562_v7  ;;  %2579 = vmatpush.bf16.msra.mxu2 %v2562_v7  ;;  %v2409_v48 = vld [vmem:[%s3408_s2 + $0xa8] sm:$0xf0]  ;;  %v2408_v50 = vor.u32 %v2547_v44, %v2407_v43  ;;  %v2348_v51 = vor.u32 %v2530_v45, %v2345_v46  ;;  %v2351_v53 = vld [vmem:[%s3408_s2 + $0x30] sm:$0xf]  ;;  %v2533_v54 = vld [vmem:[%s3408_s2 + $0x34] sm:$0xf0] }
  0xac   : > { %952 = vmatpush.bf16.msra.mxu1 %v2570_v8  ;;  %2587 = vmatpush.bf16.msra.mxu3 %v2570_v8  ;;  %v2412_v52 = vor.u32 %v2546_v47, %v2409_v48  ;;  %v2415_v55 = vld [vmem:[%s3408_s2 + $0xb0] sm:$0xf]  ;;  %v2549_v56 = vld [vmem:[%s3408_s2 + $0xb4] sm:$0xf0]  ;;  %v2532_v57 = vld [vmem:[%s3408_s2 + $0x34] sm:$0xf]  ;;  %v2352_v61 = vor.u32 %v2533_v54, %v2351_v53 }
  0xad   : > { %v2353_v58 = vld [vmem:[%s3408_s2 + $0x38] sm:$0xf0]  ;;  %v2548_v59 = vld [vmem:[%s3408_s2 + $0xb4] sm:$0xf]  ;;  %v2416_v62 = vor.u32 %v2549_v56, %v2415_v55  ;;  %v2359_v1 = vld [vmem:[%s3408_s2 + $0x40] sm:$0xf] }
  0xae   : > { %v2417_v60 = vld [vmem:[%s3408_s2 + $0xb8] sm:$0xf0]  ;;  %v2356_v63 = vor.u32 %v2532_v57, %v2353_v58  ;;  %v2535_v2 = vld [vmem:[%s3408_s2 + $0x44] sm:$0xf0]  ;;  %v2423_v3 = vld [vmem:[%s3408_s2 + $0xc0] sm:$0xf] }
  0xaf   : > { %864 = vmatpush.bf16.msra.mxu0 %v2561_v9  ;;  %2580 = vmatpush.bf16.msra.mxu2 %v2561_v9  ;;  %v2420_v0 = vor.u32 %v2548_v59, %v2417_v60  ;;  %v2551_v4 = vld [vmem:[%s3408_s2 + $0xc4] sm:$0xf0]  ;;  %v2534_v5 = vld [vmem:[%s3408_s2 + $0x44] sm:$0xf]  ;;  %v2361_v6 = vld [vmem:[%s3408_s2 + $0x48] sm:$0xf0]  ;;  %v2360_v9 = vor.u32 %v2535_v2, %v2359_v1 }
  0xb0   : > { %953 = vmatpush.bf16.msra.mxu1 %v2569_v10  ;;  %2588 = vmatpush.bf16.msra.mxu3 %v2569_v10  ;;  %v2550_v7 = vld [vmem:[%s3408_s2 + $0xc4] sm:$0xf]  ;;  %v2425_v8 = vld [vmem:[%s3408_s2 + $0xc8] sm:$0xf0]  ;;  %v2424_v10 = vor.u32 %v2551_v4, %v2423_v3  ;;  %v2536_v17 = vld [vmem:[%s3408_s2 + $0x54] sm:$0xf] }
  0xb1   : > { %v2369_v18 = vld [vmem:[%s3408_s2 + $0x58] sm:$0xf0]  ;;  %v2552_v19 = vld [vmem:[%s3408_s2 + $0xd4] sm:$0xf]  ;;  %v2538_v29 = vld [vmem:[%s3408_s2 + $0x64] sm:$0xf] }
  0xb2   : > { %v2433_v20 = vld [vmem:[%s3408_s2 + $0xd8] sm:$0xf0]  ;;  %v2372_v23 = vor.u32 %v2536_v17, %v2369_v18  ;;  %v2377_v30 = vld [vmem:[%s3408_s2 + $0x68] sm:$0xf0]  ;;  %v2554_v31 = vld [vmem:[%s3408_s2 + $0xe4] sm:$0xf] }
  0xb3   : > { %865 = vmatpush.bf16.msra.mxu0 %v2560_v11  ;;  %2581 = vmatpush.bf16.msra.mxu2 %v2560_v11  ;;  %v2364_v11 = vor.u32 %v2534_v5, %v2361_v6  ;;  %v2436_v24 = vor.u32 %v2552_v19, %v2433_v20  ;;  %v2441_v32 = vld [vmem:[%s3408_s2 + $0xe8] sm:$0xf0]  ;;  %v2380_v35 = vor.u32 %v2538_v29, %v2377_v30  ;;  %v2540_v41 = vld [vmem:[%s3408_s2 + $0x74] sm:$0xf]  ;;  %v2385_v42 = vld [vmem:[%s3408_s2 + $0x78] sm:$0xf0] }
  0xb4   : > { %954 = vmatpush.bf16.msra.mxu1 %v2568_v12  ;;  %2589 = vmatpush.bf16.msra.mxu3 %v2568_v12  ;;  %v2428_v12 = vor.u32 %v2550_v7, %v2425_v8  ;;  %v2444_v36 = vor.u32 %v2554_v31, %v2441_v32  ;;  %v2556_v43 = vld [vmem:[%s3408_s2 + $0xf4] sm:$0xf]  ;;  %v2449_v44 = vld [vmem:[%s3408_s2 + $0xf8] sm:$0xf0]  ;;  %v2388_v47 = vor.u32 %v2540_v41, %v2385_v42  ;;  %v509_v59 = vld [vmem:[#allocation2] sm:$0xff]  ;;  %p2517_p1 = scmp.ne.s32.totalorder %s3939_s15, 2 }
  0xb5   : > { %v2452_v48 = vor.u32 %v2556_v43, %v2449_v44  ;;  %v524_v55 = vld [vmem:[#allocation2 + $0x38] sm:$0xff]  ;;  %v528_v31 = vld [vmem:[#allocation2 + $0xe0] sm:$0xff]  ;;  %v529_v41 = vld [vmem:[#allocation2 + $0x90] sm:$0xff] }
  0xb6   : > { %v525_v1 = vld [vmem:[#allocation2 + $0x58] sm:$0xff] }
  0xb7   : > { %866 = vmatpush.bf16.msra.mxu0 %v2559_v13  ;;  %2582 = vmatpush.bf16.msra.mxu2 %v2559_v13  ;;  %v2367_v13 = vld [vmem:[%s3408_s2 + $0x50] sm:$0xf]  ;;  %v510_v5 = vld [vmem:[#allocation2 + $0xd8] sm:$0xff] }
  0xb8   : > { %955 = vmatpush.bf16.msra.mxu1 %v2567_v14  ;;  %2590 = vmatpush.bf16.msra.mxu3 %v2567_v14  ;;  %v2537_v14 = vld [vmem:[%s3408_s2 + $0x54] sm:$0xf0] }
  0xb9   : > { %v2368_v21 = vor.u32 %v2537_v14, %v2367_v13 }
  0xbb   : > { %867 = vmatpush.bf16.msra.mxu0 %v2558_v15  ;;  %2583 = vmatpush.bf16.msra.mxu2 %v2558_v15  ;;  %v2431_v15 = vld [vmem:[%s3408_s2 + $0xd0] sm:$0xf] }
  0xbc   : > { %956 = vmatpush.bf16.msra.mxu1 %v2566_v16  ;;  %2591 = vmatpush.bf16.msra.mxu3 %v2566_v16  ;;  %v2553_v16 = vld [vmem:[%s3408_s2 + $0xd4] sm:$0xf0] }
  0xbd   : > { %v2432_v22 = vor.u32 %v2553_v16, %v2431_v15  ;;  %v511_v15 = vld [vmem:[#allocation2 + $0x18] sm:$0xff] }
  0xbe   : > { %868 = vmatmul.bf16.vlgmr.msra.gmra.mxu0 %v2328_v25  ;;  %908 = vmatmul.bf16.vlgmr.msra.gmra.mxu2 %v2392_v26  ;;  %v2375_v25 = vld [vmem:[%s3408_s2 + $0x60] sm:$0xf]  ;;  %v2539_v26 = vld [vmem:[%s3408_s2 + $0x64] sm:$0xf0] }
  0xbf   : > { %957 = vmatmul.bf16.vlgmr.msra.gmra.mxu1 %v2332_v27  ;;  %997 = vmatmul.bf16.vlgmr.msra.gmra.mxu3 %v2396_v28  ;;  %v2439_v27 = vld [vmem:[%s3408_s2 + $0xe0] sm:$0xf]  ;;  %v2555_v28 = vld [vmem:[%s3408_s2 + $0xe4] sm:$0xf0]  ;;  %v2376_v33 = vor.u32 %v2539_v26, %v2375_v25  ;;  %v512_v25 = vld [vmem:[#allocation2 + $0x50] sm:$0xff] }
  0xc0   : > { %v2440_v34 = vor.u32 %v2555_v28, %v2439_v27 }
  0xce   : > { %873 = vmatmul.bf16.gmra.mxu0 %v2336_v37  ;;  %913 = vmatmul.bf16.gmra.mxu2 %v2400_v38  ;;  %v2383_v37 = vld [vmem:[%s3408_s2 + $0x70] sm:$0xf]  ;;  %v2541_v38 = vld [vmem:[%s3408_s2 + $0x74] sm:$0xf0] }
  0xcf   : > { %962 = vmatmul.bf16.gmra.mxu1 %v2340_v39  ;;  %1002 = vmatmul.bf16.gmra.mxu3 %v2404_v40  ;;  %v2447_v39 = vld [vmem:[%s3408_s2 + $0xf0] sm:$0xf]  ;;  %v2557_v40 = vld [vmem:[%s3408_s2 + $0xf4] sm:$0xf0]  ;;  %v2384_v45 = vor.u32 %v2541_v38, %v2383_v37 }
  0xd0   : > { %v2448_v46 = vor.u32 %v2557_v40, %v2447_v39 }
  0xde   : > { %878 = vmatmul.bf16.gmra.mxu0 %v2344_v49  ;;  %918 = vmatmul.bf16.gmra.mxu2 %v2408_v50  ;;  %v508_v50 = vld [vmem:[#allocation2 + $0xb0] sm:$0xff] }
  0xdf   : > { %967 = vmatmul.bf16.gmra.mxu1 %v2348_v51  ;;  %1007 = vmatmul.bf16.gmra.mxu3 %v2412_v52 }
  0xee   : > { %883 = vmatmul.bf16.gmra.mxu0 %v2352_v61  ;;  %923 = vmatmul.bf16.gmra.mxu2 %v2416_v62 }
  0xef   : > { %972 = vmatmul.bf16.gmra.mxu1 %v2356_v63  ;;  %1012 = vmatmul.bf16.gmra.mxu3 %v2420_v0 }
  0xfe   : > { %888 = vmatmul.bf16.gmra.mxu0 %v2360_v9  ;;  %928 = vmatmul.bf16.gmra.mxu2 %v2424_v10 }
  0xff   : > { %977 = vmatmul.bf16.gmra.mxu1 %v2364_v11  ;;  %1017 = vmatmul.bf16.gmra.mxu3 %v2428_v12  ;;  %v526_v11 = vld [vmem:[#allocation2 + $0x40] sm:$0xff] }
 0x10e   : > { %893 = vmatmul.bf16.gmra.mxu0 %v2368_v21  ;;  %933 = vmatmul.bf16.gmra.mxu2 %v2432_v22  ;;  %v527_v21 = vld [vmem:[#allocation2 + $0xc8] sm:$0xff] }
 0x10f   : > { %982 = vmatmul.bf16.gmra.mxu1 %v2372_v23  ;;  %1022 = vmatmul.bf16.gmra.mxu3 %v2436_v24 }
 0x11e   : > { %898 = vmatmul.bf16.gmra.mxu0 %v2376_v33  ;;  %938 = vmatmul.bf16.gmra.mxu2 %v2440_v34 }
 0x11f   : > { %987 = vmatmul.bf16.gmra.mxu1 %v2380_v35  ;;  %1027 = vmatmul.bf16.gmra.mxu3 %v2444_v36  ;;  %v513_v35 = vld [vmem:[#allocation2 + $0x68] sm:$0xff] }
 0x12e   : > { %903 = vmatmul.bf16.gmra.mxu0 %v2384_v45  ;;  %943 = vmatmul.bf16.gmra.mxu2 %v2448_v46  ;;  %v514_v45 = vld [vmem:[#allocation2 + $0x30] sm:$0xff] }
 0x12f   : > { %992 = vmatmul.bf16.gmra.mxu1 %v2388_v47  ;;  %1032 = vmatmul.bf16.gmra.mxu3 %v2452_v48 }
 0x13b   : > { %v869_v49 = vpop.f32.mrf.mxu0 }
 0x13c   : > { %v958_v51 = vpop.f32.mrf.mxu1 }
 0x13d   : > { %v959_v52 = vadd.f32 %v958_v51, %v869_v49  ;;  %v530_v51 = vld [vmem:[#allocation2 + $0x70] sm:$0xff] }
 0x13f   : > { %v1038_v53 = vadd.f32 %v959_v52, %v508_v50 }
 0x141   : > { %1070 = vst [vmem:[#allocation2 + $0xb0] sm:$0xff] %v1038_v53  ;;  %v909_v54 = vpop.f32.mrf.mxu2 }
 0x142   : > { %v998_v56 = vpop.f32.mrf.mxu3 }
 0x143   : > { %v999_v57 = vadd.f32 %v998_v56, %v909_v54  ;;  %v871_v58 = vpop.f32.mrf.mxu0 }
 0x144   : > { %v960_v60 = vpop.f32.mrf.mxu1 }
 0x145   : > { %v1054_v61 = vadd.f32 %v999_v57, %v524_v55  ;;  %v961_v62 = vadd.f32 %v960_v60, %v871_v58  ;;  %v515_v55 = vld [vmem:[#allocation2 + $0x48] sm:$0xff] }
 0x147   : > { %1086 = vst [vmem:[#allocation2 + $0x38] sm:$0xff] %v1054_v61  ;;  %v1039_v63 = vadd.f32 %v961_v62, %v509_v59  ;;  %v531_v61 = vld [vmem:[#allocation2 + $0xc0] sm:$0xff] }
 0x149   : > { %1071 = vst [vmem:[#allocation2] sm:$0xff] %v1039_v63  ;;  %v911_v0 = vpop.f32.mrf.mxu2 }
 0x14a   : > { %v1000_v2 = vpop.f32.mrf.mxu3 }
 0x14b   : > { %v1001_v3 = vadd.f32 %v1000_v2, %v911_v0  ;;  %v874_v4 = vpop.f32.mrf.mxu0 }
 0x14c   : > { %v963_v6 = vpop.f32.mrf.mxu1 }
 0x14d   : > { %v1055_v7 = vadd.f32 %v1001_v3, %v525_v1  ;;  %v964_v8 = vadd.f32 %v963_v6, %v874_v4  ;;  %v516_v1 = vld [vmem:[#allocation2 + $0x80] sm:$0xff] }
 0x14f   : > { %1087 = vst [vmem:[#allocation2 + $0x58] sm:$0xff] %v1055_v7  ;;  %v1040_v9 = vadd.f32 %v964_v8, %v510_v5  ;;  %v532_v7 = vld [vmem:[#allocation2 + $0xa8] sm:$0xff] }
 0x151   : > { %1072 = vst [vmem:[#allocation2 + $0xd8] sm:$0xff] %v1040_v9  ;;  %v914_v10 = vpop.f32.mrf.mxu2 }
 0x152   : > { %v1003_v12 = vpop.f32.mrf.mxu3 }
 0x153   : > { %v1004_v13 = vadd.f32 %v1003_v12, %v914_v10  ;;  %v876_v14 = vpop.f32.mrf.mxu0 }
 0x154   : > { %v965_v16 = vpop.f32.mrf.mxu1 }
 0x155   : > { %v1056_v17 = vadd.f32 %v1004_v13, %v526_v11  ;;  %v966_v18 = vadd.f32 %v965_v16, %v876_v14  ;;  %v517_v11 = vld [vmem:[#allocation2 + $0x88] sm:$0xff] }
 0x157   : > { %1088 = vst [vmem:[#allocation2 + $0x40] sm:$0xff] %v1056_v17  ;;  %v1041_v19 = vadd.f32 %v966_v18, %v511_v15  ;;  %v533_v17 = vld [vmem:[#allocation2 + $0xd0] sm:$0xff] }
 0x159   : > { %1073 = vst [vmem:[#allocation2 + $0x18] sm:$0xff] %v1041_v19  ;;  %v916_v20 = vpop.f32.mrf.mxu2 }
 0x15a   : > { %v1005_v22 = vpop.f32.mrf.mxu3 }
 0x15b   : > { %v1006_v23 = vadd.f32 %v1005_v22, %v916_v20  ;;  %v879_v24 = vpop.f32.mrf.mxu0 }
 0x15c   : > { %v968_v26 = vpop.f32.mrf.mxu1 }
 0x15d   : > { %v1057_v27 = vadd.f32 %v1006_v23, %v527_v21  ;;  %v969_v28 = vadd.f32 %v968_v26, %v879_v24  ;;  %v518_v21 = vld [vmem:[#allocation2 + $0xe8] sm:$0xff] }
 0x15f   : > { %1089 = vst [vmem:[#allocation2 + $0xc8] sm:$0xff] %v1057_v27  ;;  %v1042_v29 = vadd.f32 %v969_v28, %v512_v25  ;;  %v534_v27 = vld [vmem:[#allocation2 + $0x10] sm:$0xff] }
 0x161   : > { %1074 = vst [vmem:[#allocation2 + $0x50] sm:$0xff] %v1042_v29  ;;  %v919_v30 = vpop.f32.mrf.mxu2 }
 0x162   : > { %v1008_v32 = vpop.f32.mrf.mxu3 }
 0x163   : > { %v1009_v33 = vadd.f32 %v1008_v32, %v919_v30  ;;  %v881_v34 = vpop.f32.mrf.mxu0 }
 0x164   : > { %v970_v36 = vpop.f32.mrf.mxu1 }
 0x165   : > { %v1058_v37 = vadd.f32 %v1009_v33, %v528_v31  ;;  %v971_v38 = vadd.f32 %v970_v36, %v881_v34  ;;  %v519_v31 = vld [vmem:[#allocation2 + $0xb8] sm:$0xff] }
 0x167   : > { %1090 = vst [vmem:[#allocation2 + $0xe0] sm:$0xff] %v1058_v37  ;;  %v1043_v39 = vadd.f32 %v971_v38, %v513_v35  ;;  %v535_v37 = vld [vmem:[#allocation2 + $0x28] sm:$0xff] }
 0x169   : > { %1075 = vst [vmem:[#allocation2 + $0x68] sm:$0xff] %v1043_v39  ;;  %v921_v40 = vpop.f32.mrf.mxu2 }
 0x16a   : > { %v1010_v42 = vpop.f32.mrf.mxu3 }
 0x16b   : > { %v1011_v43 = vadd.f32 %v1010_v42, %v921_v40  ;;  %v884_v44 = vpop.f32.mrf.mxu0 }
 0x16c   : > { %v973_v46 = vpop.f32.mrf.mxu1 }
 0x16d   : > { %v1059_v47 = vadd.f32 %v1011_v43, %v529_v41  ;;  %v974_v48 = vadd.f32 %v973_v46, %v884_v44  ;;  %v520_v41 = vld [vmem:[#allocation2 + $0x60] sm:$0xff] }
 0x16f   : > { %1091 = vst [vmem:[#allocation2 + $0x90] sm:$0xff] %v1059_v47  ;;  %v1044_v49 = vadd.f32 %v974_v48, %v514_v45  ;;  %v536_v47 = vld [vmem:[#allocation2 + $0xa0] sm:$0xff] }
 0x171   : > { %1076 = vst [vmem:[#allocation2 + $0x30] sm:$0xff] %v1044_v49  ;;  %v924_v50 = vpop.f32.mrf.mxu2 }
 0x172   : > { %v1013_v52 = vpop.f32.mrf.mxu3 }
 0x173   : > { %v1014_v53 = vadd.f32 %v1013_v52, %v924_v50  ;;  %v886_v54 = vpop.f32.mrf.mxu0 }
 0x174   : > { %v975_v56 = vpop.f32.mrf.mxu1 }
 0x175   : > { %v1060_v57 = vadd.f32 %v1014_v53, %v530_v51  ;;  %v976_v58 = vadd.f32 %v975_v56, %v886_v54  ;;  %v521_v51 = vld [vmem:[#allocation2 + $0xf0] sm:$0xff] }
 0x177   : > { %1092 = vst [vmem:[#allocation2 + $0x70] sm:$0xff] %v1060_v57  ;;  %v1045_v59 = vadd.f32 %v976_v58, %v515_v55  ;;  %v537_v57 = vld [vmem:[#allocation2 + $0xf8] sm:$0xff] }
 0x179   : > { %1077 = vst [vmem:[#allocation2 + $0x48] sm:$0xff] %v1045_v59  ;;  %v926_v60 = vpop.f32.mrf.mxu2 }
 0x17a   : > { %v1015_v62 = vpop.f32.mrf.mxu3 }
 0x17b   : > { %v1016_v63 = vadd.f32 %v1015_v62, %v926_v60  ;;  %v889_v0 = vpop.f32.mrf.mxu0 }
 0x17c   : > { %v978_v2 = vpop.f32.mrf.mxu1 }
 0x17d   : > { %v1061_v3 = vadd.f32 %v1016_v63, %v531_v61  ;;  %v979_v4 = vadd.f32 %v978_v2, %v889_v0  ;;  %v522_v61 = vld [vmem:[#allocation2 + $0x8] sm:$0xff] }
 0x17f   : > { %1093 = vst [vmem:[#allocation2 + $0xc0] sm:$0xff] %v1061_v3  ;;  %v1046_v5 = vadd.f32 %v979_v4, %v516_v1  ;;  %v538_v3 = vld [vmem:[#allocation2 + $0x20] sm:$0xff] }
 0x181   : > { %1078 = vst [vmem:[#allocation2 + $0x80] sm:$0xff] %v1046_v5  ;;  %v929_v6 = vpop.f32.mrf.mxu2 }
 0x182   : > { %v1018_v8 = vpop.f32.mrf.mxu3 }
 0x183   : > { %v1019_v9 = vadd.f32 %v1018_v8, %v929_v6  ;;  %v891_v10 = vpop.f32.mrf.mxu0 }
 0x184   : > { %v980_v12 = vpop.f32.mrf.mxu1 }
 0x185   : > { %v1062_v13 = vadd.f32 %v1019_v9, %v532_v7  ;;  %v981_v14 = vadd.f32 %v980_v12, %v891_v10  ;;  %v523_v7 = vld [vmem:[#allocation2 + $0x78] sm:$0xff] }
 0x187   : > { %1094 = vst [vmem:[#allocation2 + $0xa8] sm:$0xff] %v1062_v13  ;;  %v1047_v15 = vadd.f32 %v981_v14, %v517_v11  ;;  %v539_v13 = vld [vmem:[#allocation2 + $0x98] sm:$0xff] }
 0x189   : > { %1079 = vst [vmem:[#allocation2 + $0x88] sm:$0xff] %v1047_v15  ;;  %v931_v16 = vpop.f32.mrf.mxu2 }
 0x18a   : > { %v1020_v18 = vpop.f32.mrf.mxu3 }
 0x18b   : > { %v1021_v19 = vadd.f32 %v1020_v18, %v931_v16  ;;  %v894_v20 = vpop.f32.mrf.mxu0 }
 0x18c   : > { %v983_v22 = vpop.f32.mrf.mxu1 }
 0x18d   : > { %v1063_v23 = vadd.f32 %v1021_v19, %v533_v17  ;;  %v984_v24 = vadd.f32 %v983_v22, %v894_v20 }
 0x18f   : > { %1095 = vst [vmem:[#allocation2 + $0xd0] sm:$0xff] %v1063_v23  ;;  %v1048_v25 = vadd.f32 %v984_v24, %v518_v21 }
 0x191   : > { %1080 = vst [vmem:[#allocation2 + $0xe8] sm:$0xff] %v1048_v25  ;;  %v934_v26 = vpop.f32.mrf.mxu2 }
 0x192   : > { %v1023_v28 = vpop.f32.mrf.mxu3 }
 0x193   : > { %v1024_v29 = vadd.f32 %v1023_v28, %v934_v26  ;;  %v896_v30 = vpop.f32.mrf.mxu0 }
 0x194   : > { %v985_v32 = vpop.f32.mrf.mxu1 }
 0x195   : > { %v1064_v33 = vadd.f32 %v1024_v29, %v534_v27  ;;  %v986_v34 = vadd.f32 %v985_v32, %v896_v30 }
 0x197   : > { %1096 = vst [vmem:[#allocation2 + $0x10] sm:$0xff] %v1064_v33  ;;  %v1049_v35 = vadd.f32 %v986_v34, %v519_v31 }
 0x199   : > { %1081 = vst [vmem:[#allocation2 + $0xb8] sm:$0xff] %v1049_v35  ;;  %v936_v36 = vpop.f32.mrf.mxu2 }
 0x19a   : > { %v1025_v38 = vpop.f32.mrf.mxu3 }
 0x19b   : > { %v1026_v39 = vadd.f32 %v1025_v38, %v936_v36  ;;  %v899_v40 = vpop.f32.mrf.mxu0 }
 0x19c   : > { %v988_v42 = vpop.f32.mrf.mxu1 }
 0x19d   : > { %v1065_v43 = vadd.f32 %v1026_v39, %v535_v37  ;;  %v989_v44 = vadd.f32 %v988_v42, %v899_v40 }
 0x19f   : > { %1097 = vst [vmem:[#allocation2 + $0x28] sm:$0xff] %v1065_v43  ;;  %v1050_v45 = vadd.f32 %v989_v44, %v520_v41 }
 0x1a1   : > { %1082 = vst [vmem:[#allocation2 + $0x60] sm:$0xff] %v1050_v45  ;;  %v939_v46 = vpop.f32.mrf.mxu2 }
 0x1a2   : > { %v1028_v48 = vpop.f32.mrf.mxu3 }
 0x1a3   : > { %v1029_v49 = vadd.f32 %v1028_v48, %v939_v46  ;;  %v901_v50 = vpop.f32.mrf.mxu0 }
 0x1a4   : > { %v990_v52 = vpop.f32.mrf.mxu1 }
 0x1a5   : > { %v1066_v53 = vadd.f32 %v1029_v49, %v536_v47  ;;  %v991_v54 = vadd.f32 %v990_v52, %v901_v50 }
 0x1a7   : > { %1098 = vst [vmem:[#allocation2 + $0xa0] sm:$0xff] %v1066_v53  ;;  %v1051_v55 = vadd.f32 %v991_v54, %v521_v51 }
 0x1a9   : > { %1083 = vst [vmem:[#allocation2 + $0xf0] sm:$0xff] %v1051_v55  ;;  %v941_v56 = vpop.f32.mrf.mxu2 }
 0x1aa   : > { %v1030_v58 = vpop.f32.mrf.mxu3 }
 0x1ab   : > { %v1031_v59 = vadd.f32 %v1030_v58, %v941_v56  ;;  %v904_v60 = vpop.f32.mrf.mxu0 }
 0x1ac   : > { %v993_v62 = vpop.f32.mrf.mxu1 }
 0x1ad   : > { %v1067_v63 = vadd.f32 %v1031_v59, %v537_v57  ;;  %v994_v0 = vadd.f32 %v993_v62, %v904_v60 }
 0x1af   : > { %1099 = vst [vmem:[#allocation2 + $0xf8] sm:$0xff] %v1067_v63  ;;  %v1052_v1 = vadd.f32 %v994_v0, %v522_v61 }
 0x1b1   : > { %1084 = vst [vmem:[#allocation2 + $0x8] sm:$0xff] %v1052_v1  ;;  %v944_v2 = vpop.f32.mrf.mxu2 }
 0x1b2   : > { %v1033_v4 = vpop.f32.mrf.mxu3 }
 0x1b3   : > { %v1034_v5 = vadd.f32 %v1033_v4, %v944_v2  ;;  %v906_v6 = vpop.f32.mrf.mxu0 }
 0x1b4   : > { %v995_v8 = vpop.f32.mrf.mxu1 }
 0x1b5   : > { %v1068_v9 = vadd.f32 %v1034_v5, %v538_v3  ;;  %v996_v10 = vadd.f32 %v995_v8, %v906_v6 }
 0x1b7   : > { %1100 = vst [vmem:[#allocation2 + $0x20] sm:$0xff] %v1068_v9  ;;  %v1053_v11 = vadd.f32 %v996_v10, %v523_v7 }
 0x1b9   : > { %1085 = vst [vmem:[#allocation2 + $0x78] sm:$0xff] %v1053_v11  ;;  %v946_v12 = vpop.f32.mrf.mxu2 }
 0x1ba   : > { %v1035_v14 = vpop.f32.mrf.mxu3 }
 0x1bb   : > { %v1036_v15 = vadd.f32 %v1035_v14, %v946_v12  ;;  %1105 = sbr.rel (%p2517_p1) target bundleno = 956 (0x3bc), region = 80 }
 0x1bd   : > { %v1069_v16 = vadd.f32 %v1036_v15, %v539_v13 }
 0x1bf   : > { %1101 = vst [vmem:[#allocation2 + $0x98] sm:$0xff] %v1069_v16 }
 0x1c0   : > { %v1142_v17 = vld [vmem:[%s3445_s19 + $0x20] sm:$0xff]  ;;  %v1140_v18 = vld [vmem:[%s3445_s19 + $0x10] sm:$0xff]  ;;  %v3129_v20 = vmov 0   ;;  %v1143_v21 = vld [vmem:[%s3445_s19 + $0x28] sm:$0xff] }
 0x1c1   : > { %v1138_v19 = vld [vmem:[%s3445_s19] sm:$0xff]  ;;  %2773 = vset.pattern.permute.xlu2 %v3129_v20  ;;  %2772 = vset.pattern.permute.xlu1 %v3129_v20  ;;  %v1141_v22 = vld [vmem:[%s3445_s19 + $0x18] sm:$0xff]  ;;  %v1139_v23 = vld [vmem:[%s3445_s19 + $0x8] sm:$0xff] }
 0x1c2   : > { %2771 = vset.pattern.permute.xlu0 %v3129_v20  ;;  %1192 = vperm.xlu2 %2773, %v1142_v17   ;;  %v1146_v24 = vld [vmem:[%s3445_s19 + $0x40] sm:$0xff]  ;;  %v1145_v25 = vld [vmem:[%s3445_s19 + $0x38] sm:$0xff]  ;;  %v1144_v26 = vld [vmem:[%s3445_s19 + $0x30] sm:$0xff] }
 0x1c3   : > { %1182 = vperm.xlu1 %2772, %v1140_v18   ;;  %1172 = vperm.xlu0 %2771, %v1138_v19   ;;  %v1149_v27 = vld [vmem:[%s3445_s19 + $0x58] sm:$0xff]  ;;  %v1148_v28 = vld [vmem:[%s3445_s19 + $0x50] sm:$0xff]  ;;  %v1147_v29 = vld [vmem:[%s3445_s19 + $0x48] sm:$0xff] }
 0x1c4   : > { %v1152_v30 = vld [vmem:[%s3445_s19 + $0x70] sm:$0xff]  ;;  %v1151_v31 = vld [vmem:[%s3445_s19 + $0x68] sm:$0xff]  ;;  %v1150_v32 = vld [vmem:[%s3445_s19 + $0x60] sm:$0xff] }
 0x1c5   : > { %v1155_v33 = vld [vmem:[%s3445_s19 + $0x88] sm:$0xff]  ;;  %v1154_v34 = vld [vmem:[%s3445_s19 + $0x80] sm:$0xff]  ;;  %v1153_v35 = vld [vmem:[%s3445_s19 + $0x78] sm:$0xff] }
 0x1c6   : > { %v1158_v36 = vld [vmem:[%s3445_s19 + $0xa0] sm:$0xff]  ;;  %v1157_v37 = vld [vmem:[%s3445_s19 + $0x98] sm:$0xff]  ;;  %v1156_v38 = vld [vmem:[%s3445_s19 + $0x90] sm:$0xff] }
 0x1c7   : > { %v1392_v39 = vld [vmem:[#allocation9 + $0xf0] sm:$0xff]  ;;  %v1393_v40 = vld [vmem:[#allocation9 + $0xf8] sm:$0xff]  ;;  %v1390_v41 = vld [vmem:[#allocation9 + $0xe0] sm:$0xff] }
 0x1c8   : > { %1684 = vmatpush.msra.mxu2 %v1392_v39  ;;  %1797 = vmatpush.msra.mxu3 %v1393_v40  ;;  %v1391_v42 = vld [vmem:[#allocation9 + $0xe8] sm:$0xff]  ;;  %v1388_v43 = vld [vmem:[#allocation9 + $0xd0] sm:$0xff]  ;;  %v1389_v44 = vld [vmem:[#allocation9 + $0xd8] sm:$0xff] }
 0x1c9   : > { %v1161_v45 = vld [vmem:[%s3445_s19 + $0xb8] sm:$0xff]  ;;  %v1160_v46 = vld [vmem:[%s3445_s19 + $0xb0] sm:$0xff]  ;;  %v1159_v47 = vld [vmem:[%s3445_s19 + $0xa8] sm:$0xff] }
 0x1ca   : > { %1197 = vperm.xlu2 %2773, %v1143_v21   ;;  %1685 = vmatpush.msra.mxu2 %v1390_v41  ;;  %v1164_v48 = vld [vmem:[%s3445_s19 + $0xd0] sm:$0xff]  ;;  %v1457_v50 = vld [vmem:[#allocation11 + $0xf8] sm:$0xff]  ;;  %v1386_v51 = vld [vmem:[#allocation9 + $0xc0] sm:$0xff] }
 0x1cb   : > { %1187 = vperm.xlu1 %2772, %v1141_v22   ;;  %1177 = vperm.xlu0 %2771, %v1139_v23   ;;  %v1456_v49 = vld [vmem:[#allocation11 + $0xf0] sm:$0xff]  ;;  %v1387_v52 = vld [vmem:[#allocation9 + $0xc8] sm:$0xff]  ;;  %v1454_v53 = vld [vmem:[#allocation11 + $0xe0] sm:$0xff] }
 0x1cc   : > { %1798 = vmatpush.msra.mxu3 %v1391_v42  ;;  %1686 = vmatpush.msra.mxu2 %v1388_v43  ;;  %v1455_v54 = vld [vmem:[#allocation11 + $0xe8] sm:$0xff]  ;;  %v1384_v55 = vld [vmem:[#allocation9 + $0xb0] sm:$0xff]  ;;  %v1385_v56 = vld [vmem:[#allocation9 + $0xb8] sm:$0xff] }
 0x1cd   : > { %1458 = vmatpush.msra.mxu0 %v1456_v49  ;;  %1571 = vmatpush.msra.mxu1 %v1457_v50  ;;  %v1452_v57 = vld [vmem:[#allocation11 + $0xd0] sm:$0xff]  ;;  %v1163_v58 = vld [vmem:[%s3445_s19 + $0xc8] sm:$0xff]  ;;  %v1162_v59 = vld [vmem:[%s3445_s19 + $0xc0] sm:$0xff] }
 0x1ce   : > { %1799 = vmatpush.msra.mxu3 %v1389_v44  ;;  %1687 = vmatpush.msra.mxu2 %v1386_v51  ;;  %v1453_v60 = vld [vmem:[#allocation11 + $0xd8] sm:$0xff]  ;;  %v1382_v61 = vld [vmem:[#allocation9 + $0xa0] sm:$0xff]  ;;  %v1383_v62 = vld [vmem:[#allocation9 + $0xa8] sm:$0xff] }
 0x1cf   : > { %1459 = vmatpush.msra.mxu0 %v1454_v53  ;;  %1572 = vmatpush.msra.mxu1 %v1455_v54  ;;  %v1450_v63 = vld [vmem:[#allocation11 + $0xc0] sm:$0xff]  ;;  %v1451_v0 = vld [vmem:[#allocation11 + $0xc8] sm:$0xff]  ;;  %v1380_v1 = vld [vmem:[#allocation9 + $0x90] sm:$0xff] }
 0x1d0   : > { %1800 = vmatpush.msra.mxu3 %v1387_v52  ;;  %1688 = vmatpush.msra.mxu2 %v1384_v55  ;;  %v1381_v2 = vld [vmem:[#allocation9 + $0x98] sm:$0xff]  ;;  %v1448_v3 = vld [vmem:[#allocation11 + $0xb0] sm:$0xff]  ;;  %v1378_v5 = vld [vmem:[#allocation9 + $0x80] sm:$0xff] }
 0x1d1   : > { %1460 = vmatpush.msra.mxu0 %v1452_v57  ;;  %1573 = vmatpush.msra.mxu1 %v1453_v60  ;;  %v1449_v4 = vld [vmem:[#allocation11 + $0xb8] sm:$0xff]  ;;  %v1379_v6 = vld [vmem:[#allocation9 + $0x88] sm:$0xff]  ;;  %v1446_v7 = vld [vmem:[#allocation11 + $0xa0] sm:$0xff] }
 0x1d2   : > { %1212 = vperm.xlu2 %2773, %v1146_v24   ;;  %1801 = vmatpush.msra.mxu3 %v1385_v56  ;;  %v1167_v8 = vld [vmem:[%s3445_s19 + $0xe8] sm:$0xff]  ;;  %v1166_v10 = vld [vmem:[%s3445_s19 + $0xe0] sm:$0xff]  ;;  %v1165_v11 = vld [vmem:[%s3445_s19 + $0xd8] sm:$0xff] }
 0x1d3   : > { %1207 = vperm.xlu1 %2772, %v1145_v25   ;;  %1202 = vperm.xlu0 %2771, %v1144_v26   ;;  %v1447_v9 = vld [vmem:[#allocation11 + $0xa8] sm:$0xff]  ;;  %v1376_v12 = vld [vmem:[#allocation9 + $0x70] sm:$0xff]  ;;  %v1377_v13 = vld [vmem:[#allocation9 + $0x78] sm:$0xff] }
 0x1d4   : > { %1689 = vmatpush.msra.mxu2 %v1382_v61  ;;  %1802 = vmatpush.msra.mxu3 %v1383_v62  ;;  %v1444_v14 = vld [vmem:[#allocation11 + $0x90] sm:$0xff]  ;;  %v1445_v15 = vld [vmem:[#allocation11 + $0x98] sm:$0xff]  ;;  %v1374_v16 = vld [vmem:[#allocation9 + $0x60] sm:$0xff] }
 0x1d5   : > { %1461 = vmatpush.msra.mxu0 %v1450_v63  ;;  %1574 = vmatpush.msra.mxu1 %v1451_v0  ;;  %v1375_v17 = vld [vmem:[#allocation9 + $0x68] sm:$0xff]  ;;  %v1442_v18 = vld [vmem:[#allocation11 + $0x80] sm:$0xff]  ;;  %v1372_v20 = vld [vmem:[#allocation9 + $0x50] sm:$0xff] }
 0x1d6   : > { %1690 = vmatpush.msra.mxu2 %v1380_v1  ;;  %1803 = vmatpush.msra.mxu3 %v1381_v2  ;;  %v1443_v19 = vld [vmem:[#allocation11 + $0x88] sm:$0xff]  ;;  %v1373_v21 = vld [vmem:[#allocation9 + $0x58] sm:$0xff]  ;;  %v1440_v22 = vld [vmem:[#allocation11 + $0x70] sm:$0xff] }
 0x1d7   : > { %1462 = vmatpush.msra.mxu0 %v1448_v3  ;;  %1575 = vmatpush.msra.mxu1 %v1449_v4  ;;  %v1441_v23 = vld [vmem:[#allocation11 + $0x78] sm:$0xff]  ;;  %v1370_v24 = vld [vmem:[#allocation9 + $0x40] sm:$0xff]  ;;  %v1371_v25 = vld [vmem:[#allocation9 + $0x48] sm:$0xff] }
 0x1d8   : > { %1691 = vmatpush.msra.mxu2 %v1378_v5  ;;  %1804 = vmatpush.msra.mxu3 %v1379_v6  ;;  %v1169_v26 = vld [vmem:[%s3445_s19 + $0xf8] sm:$0xff]  ;;  %v1432_v40 = vld [vmem:[#allocation11 + $0x30] sm:$0xff]  ;;  %v1362_v42 = vld [vmem:[#allocation9] sm:$0xff] }
 0x1d9   : > { %1463 = vmatpush.msra.mxu0 %v1446_v7  ;;  %1576 = vmatpush.msra.mxu1 %v1447_v9  ;;  %v1365_v39 = vld [vmem:[#allocation9 + $0x18] sm:$0xff]  ;;  %v1363_v43 = vld [vmem:[#allocation9 + $0x8] sm:$0xff]  ;;  %v1430_v44 = vld [vmem:[#allocation11 + $0x20] sm:$0xff] }
 0x1da   : > { %1227 = vperm.xlu2 %2773, %v1149_v27   ;;  %1692 = vmatpush.msra.mxu2 %v1376_v12  ;;  %v1168_v27 = vld [vmem:[%s3445_s19 + $0xf0] sm:$0xff]  ;;  %v1433_v41 = vld [vmem:[#allocation11 + $0x38] sm:$0xff]  ;;  %v1427_v49 = vld [vmem:[#allocation11 + $0x8] sm:$0xff] }
 0x1db   : > { %1222 = vperm.xlu1 %2772, %v1148_v28   ;;  %1217 = vperm.xlu0 %2771, %v1147_v29   ;;  %v1438_v28 = vld [vmem:[#allocation11 + $0x60] sm:$0xff]  ;;  %v1439_v29 = vld [vmem:[#allocation11 + $0x68] sm:$0xff]  ;;  %v1396_v52 = vld [vmem:[%s3426_s20 + $0x10] sm:$0xff] }
 0x1dc   : > { %1805 = vmatpush.msra.mxu3 %v1377_v13  ;;  %1464 = vmatpush.msra.mxu0 %v1444_v14  ;;  %v1394_v50 = vld [vmem:[%s3426_s20] sm:$0xff]  ;;  %v1395_v51 = vld [vmem:[%s3426_s20 + $0x8] sm:$0xff]  ;;  %v1106_v53 = vld [vmem:[#allocation2 + $0xb0] sm:$0xff] }
 0x1dd   : > { %1577 = vmatpush.msra.mxu1 %v1445_v15  ;;  %1693 = vmatpush.msra.mxu2 %v1374_v16  ;;  %v1397_v56 = vld [vmem:[%s3426_s20 + $0x18] sm:$0xff]  ;;  %v1107_v57 = vld [vmem:[#allocation2] sm:$0xff]  ;;  %v1399_v0 = vld [vmem:[%s3426_s20 + $0x28] sm:$0xff] }
 0x1de   : > { %1806 = vmatpush.msra.mxu3 %v1375_v17  ;;  %1465 = vmatpush.msra.mxu0 %v1442_v18  ;;  %v1398_v60 = vld [vmem:[%s3426_s20 + $0x20] sm:$0xff]  ;;  %v1108_v61 = vld [vmem:[#allocation2 + $0xd8] sm:$0xff]  ;;  %v1400_v4 = vld [vmem:[%s3426_s20 + $0x30] sm:$0xff] }
 0x1df   : > { %1578 = vmatpush.msra.mxu1 %v1443_v19  ;;  %1694 = vmatpush.msra.mxu2 %v1372_v20  ;;  %v1109_v1 = vld [vmem:[#allocation2 + $0x18] sm:$0xff]  ;;  %v1110_v5 = vld [vmem:[#allocation2 + $0x50] sm:$0xff]  ;;  %v1111_v9 = vld [vmem:[#allocation2 + $0x68] sm:$0xff] }
 0x1e0   : > { %1807 = vmatpush.msra.mxu3 %v1373_v21  ;;  %1466 = vmatpush.msra.mxu0 %v1440_v22  ;;  %v1402_v12 = vld [vmem:[%s3426_s20 + $0x40] sm:$0xff]  ;;  %v1112_v14 = vld [vmem:[#allocation2 + $0x30] sm:$0xff]  ;;  %v1403_v16 = vld [vmem:[%s3426_s20 + $0x48] sm:$0xff] }
 0x1e1   : > { %1579 = vmatpush.msra.mxu1 %v1441_v23  ;;  %1695 = vmatpush.msra.mxu2 %v1370_v24  ;;  %v1113_v18 = vld [vmem:[#allocation2 + $0x48] sm:$0xff]  ;;  %v1404_v20 = vld [vmem:[%s3426_s20 + $0x50] sm:$0xff]  ;;  %v1114_v21 = vld [vmem:[#allocation2 + $0x80] sm:$0xff] }
 0x1e2   : > { %1242 = vperm.xlu2 %2773, %v1152_v30   ;;  %1808 = vmatpush.msra.mxu3 %v1371_v25  ;;  %v1368_v30 = vld [vmem:[#allocation9 + $0x30] sm:$0xff]  ;;  %v1405_v24 = vld [vmem:[%s3426_s20 + $0x58] sm:$0xff] }
 0x1e3   : > { %1237 = vperm.xlu1 %2772, %v1151_v31   ;;  %1232 = vperm.xlu0 %2771, %v1150_v32   ;;  %v1369_v31 = vld [vmem:[#allocation9 + $0x38] sm:$0xff]  ;;  %v1436_v32 = vld [vmem:[#allocation11 + $0x50] sm:$0xff] }
 0x1e4   : > { %1467 = vmatpush.msra.mxu0 %v1438_v28  ;;  %1580 = vmatpush.msra.mxu1 %v1439_v29  ;;  %v1406_v28 = vld [vmem:[%s3426_s20 + $0x60] sm:$0xff] }
 0x1e5   : > { %1696 = vmatpush.msra.mxu2 %v1368_v30  ;;  %1809 = vmatpush.msra.mxu3 %v1369_v31  ;;  %v1116_v30 = vld [vmem:[#allocation2 + $0xe8] sm:$0xff] }
 0x1e6   : > { %1468 = vmatpush.msra.mxu0 %v1436_v32  ;;  %v1407_v32 = vld [vmem:[%s3426_s20 + $0x68] sm:$0xff] }
 0x1ea   : > { %1257 = vperm.xlu2 %2773, %v1155_v33   ;;  %v1437_v33 = vld [vmem:[#allocation11 + $0x58] sm:$0xff] }
 0x1eb   : > { %1252 = vperm.xlu1 %2772, %v1154_v34   ;;  %1247 = vperm.xlu0 %2771, %v1153_v35   ;;  %v1366_v34 = vld [vmem:[#allocation9 + $0x20] sm:$0xff]  ;;  %v1367_v35 = vld [vmem:[#allocation9 + $0x28] sm:$0xff] }
 0x1ec   : > { %1581 = vmatpush.msra.mxu1 %v1437_v33  ;;  %1697 = vmatpush.msra.mxu2 %v1366_v34  ;;  %v1117_v33 = vld [vmem:[#allocation2 + $0xb8] sm:$0xff] }
 0x1ed   : > { %1810 = vmatpush.msra.mxu3 %v1367_v35 }
 0x1ef   : > { %1811 = vmatpush.msra.mxu3 %v1365_v39 }
 0x1f1   : > { %1812 = vmatpush.msra.mxu3 %v1363_v43 }
 0x1f2   : > { %1272 = vperm.xlu2 %2773, %v1158_v36   ;;  %v1434_v36 = vld [vmem:[#allocation11 + $0x40] sm:$0xff] }
 0x1f3   : > { %1267 = vperm.xlu1 %2772, %v1157_v37   ;;  %1262 = vperm.xlu0 %2771, %v1156_v38   ;;  %v1435_v37 = vld [vmem:[#allocation11 + $0x48] sm:$0xff]  ;;  %v1364_v38 = vld [vmem:[#allocation9 + $0x10] sm:$0xff] }
 0x1f4   : > { %1469 = vmatpush.msra.mxu0 %v1434_v36  ;;  %1582 = vmatpush.msra.mxu1 %v1435_v37  ;;  %v1408_v36 = vld [vmem:[%s3426_s20 + $0x70] sm:$0xff] }
 0x1f5   : > { %1698 = vmatpush.msra.mxu2 %v1364_v38  ;;  %v1118_v38 = vld [vmem:[#allocation2 + $0x60] sm:$0xff] }
 0x1f6   : > { %1470 = vmatpush.msra.mxu0 %v1432_v40  ;;  %1583 = vmatpush.msra.mxu1 %v1433_v41  ;;  %v1409_v40 = vld [vmem:[%s3426_s20 + $0x78] sm:$0xff] }
 0x1f7   : > { %1699 = vmatpush.msra.mxu2 %v1362_v42  ;;  %v1119_v42 = vld [vmem:[#allocation2 + $0xf0] sm:$0xff] }
 0x1f8   : > { %1471 = vmatpush.msra.mxu0 %v1430_v44 }
 0x1fa   : > { %1287 = vperm.xlu2 %2773, %v1161_v45   ;;  %v1431_v45 = vld [vmem:[#allocation11 + $0x28] sm:$0xff] }
 0x1fb   : > { %1282 = vperm.xlu1 %2772, %v1160_v46   ;;  %1277 = vperm.xlu0 %2771, %v1159_v47   ;;  %v1428_v46 = vld [vmem:[#allocation11 + $0x10] sm:$0xff]  ;;  %v1429_v47 = vld [vmem:[#allocation11 + $0x18] sm:$0xff] }
 0x1fc   : > { %1584 = vmatpush.msra.mxu1 %v1431_v45  ;;  %1472 = vmatpush.msra.mxu0 %v1428_v46  ;;  %v1410_v46 = vld [vmem:[%s3426_s20 + $0x80] sm:$0xff] }
 0x1fe   : > { %1585 = vmatpush.msra.mxu1 %v1429_v47  ;;  %v1120_v47 = vld [vmem:[#allocation2 + $0x8] sm:$0xff] }
 0x200   : > { %1586 = vmatpush.msra.mxu1 %v1427_v49 }
 0x201   : > { %1587 = vmatmul.f32.vlgmr.msra.gmra.mxu1 %v1394_v50 }
 0x202   : > { %1302 = vperm.xlu2 %2773, %v1164_v48   ;;  %v1426_v48 = vld [vmem:[#allocation11] sm:$0xff] }
 0x203   : > { %1297 = vperm.xlu1 %2772, %v1163_v58   ;;  %1292 = vperm.xlu0 %2771, %v1162_v59  }
 0x204   : > { %1473 = vmatpush.msra.mxu0 %v1426_v48 }
 0x205   : > { %1474 = vmatmul.f32.vlgmr.msra.gmra.mxu0 %v1394_v50 }
 0x209   : > { %1590 = vmatmul.f32.gmra.mxu1 %v1395_v51 }
 0x20a   : > { %1317 = vperm.xlu2 %2773, %v1167_v8   ;;  %v1401_v8 = vld [vmem:[%s3426_s20 + $0x38] sm:$0xff] }
 0x20b   : > { %1312 = vperm.xlu1 %2772, %v1166_v10   ;;  %1307 = vperm.xlu0 %2771, %v1165_v11  }
 0x20d   : > { %1477 = vmatmul.f32.gmra.mxu0 %v1395_v51 }
 0x211   : > { %1593 = vmatmul.f32.gmra.mxu1 %v1396_v52 }
 0x213   : > { %1327 = vperm.xlu1 %2772, %v1169_v26   ;;  %1322 = vperm.xlu0 %2771, %v1168_v27   ;;  %v1115_v26 = vld [vmem:[#allocation2 + $0x88] sm:$0xff] }
 0x215   : > { %1480 = vmatmul.f32.gmra.mxu0 %v1396_v52  ;;  %v1411_v52 = vld [vmem:[%s3426_s20 + $0x88] sm:$0xff] }
 0x219   : > { %1596 = vmatmul.f32.gmra.mxu1 %v1397_v56 }
 0x21c   : > { %v1193_v6 = vpop.permute.xlu2 %1192 }
 0x21d   : > { %1483 = vmatmul.f32.gmra.mxu0 %v1397_v56  ;;  %v1334_v7 = vmul.f32 %v1193_v6, %v1110_v5 }
 0x221   : > { %1599 = vmatmul.f32.gmra.mxu1 %v1398_v60 }
 0x224   : > { %v1198_v10 = vpop.permute.xlu2 %1197 }
 0x225   : > { %1486 = vmatmul.f32.gmra.mxu0 %v1398_v60  ;;  %v1335_v11 = vmul.f32 %v1198_v10, %v1111_v9  ;;  %v1122_v60 = vld [vmem:[#allocation2 + $0x38] sm:$0xff] }
 0x229   : > { %1602 = vmatmul.f32.gmra.mxu1 %v1399_v0 }
 0x22c   : > { %v1213_v22 = vpop.permute.xlu2 %1212 }
 0x22d   : > { %1489 = vmatmul.f32.gmra.mxu0 %v1399_v0  ;;  %v1338_v23 = vmul.f32 %v1213_v22, %v1114_v21  ;;  %v1413_v0 = vld [vmem:[%s3426_s20 + $0x98] sm:$0xff] }
 0x231   : > { %1605 = vmatmul.f32.gmra.mxu1 %v1400_v4 }
 0x234   : > { %v1228_v34 = vpop.permute.xlu2 %1227 }
 0x235   : > { %v1173_v54 = vpop.permute.xlu0 %1172  ;;  %v1183_v62 = vpop.permute.xlu1 %1182  ;;  %1492 = vmatmul.f32.gmra.mxu0 %v1400_v4  ;;  %v1341_v35 = vmul.f32 %v1228_v34, %v1117_v33  ;;  %v1123_v4 = vld [vmem:[#allocation2 + $0x58] sm:$0xff]  ;;  %v1125_v33 = vld [vmem:[#allocation2 + $0xc8] sm:$0xff] }
 0x236   : > { %v1330_v55 = vmul.f32 %v1173_v54, %v1106_v53  ;;  %v1332_v63 = vmul.f32 %v1183_v62, %v1108_v61  ;;  %v1121_v54 = vld [vmem:[#allocation2 + $0x78] sm:$0xff] }
 0x238   : > { %1700 = vmatmul.f32.vlgmr.msra.gmra.mxu2 %v1330_v55  ;;  %1813 = vmatmul.f32.vlgmr.msra.gmra.mxu3 %v1330_v55 }
 0x239   : > { %1608 = vmatmul.f32.gmra.mxu1 %v1401_v8 }
 0x23c   : > { %v1243_v48 = vpop.permute.xlu2 %1242 }
 0x23d   : > { %v1178_v58 = vpop.permute.xlu0 %1177  ;;  %v1188_v2 = vpop.permute.xlu1 %1187  ;;  %1495 = vmatmul.f32.gmra.mxu0 %v1401_v8  ;;  %v1344_v49 = vmul.f32 %v1243_v48, %v1120_v47 }
 0x23e   : > { %v1331_v59 = vmul.f32 %v1178_v58, %v1107_v57  ;;  %v1333_v3 = vmul.f32 %v1188_v2, %v1109_v1  ;;  %v1412_v58 = vld [vmem:[%s3426_s20 + $0x90] sm:$0xff]  ;;  %v1910_v1 = vld [vmem:[#allocation12] sm:$0x3] }
 0x23f   : > { %v3591_v2 = vperm.slane %v1910_v1, 0 }
 0x240   : > { %1703 = vmatmul.f32.gmra.mxu2 %v1331_v59  ;;  %1816 = vmatmul.f32.gmra.mxu3 %v1331_v59 }
 0x241   : > { %1611 = vmatmul.f32.gmra.mxu1 %v1402_v12 }
 0x244   : > { %v1258_v9 = vpop.permute.xlu2 %1257 }
 0x245   : > { %1498 = vmatmul.f32.gmra.mxu0 %v1402_v12  ;;  %v1203_v13 = vpop.permute.xlu0 %1202  ;;  %v1208_v17 = vpop.permute.xlu1 %1207  ;;  %v1347_v10 = vmul.f32 %v1258_v9, %v1123_v4  ;;  %v1418_v9 = vld [vmem:[%s3426_s20 + $0xc0] sm:$0xff] }
 0x246   : > { %v1336_v15 = vmul.f32 %v1203_v13, %v1112_v14  ;;  %v1337_v19 = vmul.f32 %v1208_v17, %v1113_v18 }
 0x248   : > { %1706 = vmatmul.f32.gmra.mxu2 %v1332_v63  ;;  %1819 = vmatmul.f32.gmra.mxu3 %v1332_v63 }
 0x249   : > { %1614 = vmatmul.f32.gmra.mxu1 %v1403_v16 }
 0x24d   : > { %1501 = vmatmul.f32.gmra.mxu0 %v1403_v16  ;;  %v1218_v25 = vpop.permute.xlu0 %1217  ;;  %v1223_v29 = vpop.permute.xlu1 %1222 }
 0x24e   : > { %v1339_v27 = vmul.f32 %v1218_v25, %v1115_v26  ;;  %v1340_v31 = vmul.f32 %v1223_v29, %v1116_v30  ;;  %v1415_v29 = vld [vmem:[%s3426_s20 + $0xa8] sm:$0xff] }
 0x250   : > { %1709 = vmatmul.f32.gmra.mxu2 %v1333_v3  ;;  %1822 = vmatmul.f32.gmra.mxu3 %v1333_v3  ;;  %v3593_v3 = vperm.slane %v1910_v1, 1 }
 0x251   : > { %1617 = vmatmul.f32.gmra.mxu1 %v1404_v20 }
 0x255   : > { %1504 = vmatmul.f32.gmra.mxu0 %v1404_v20  ;;  %v1233_v37 = vpop.permute.xlu0 %1232  ;;  %v1238_v41 = vpop.permute.xlu1 %1237 }
 0x256   : > { %v1342_v39 = vmul.f32 %v1233_v37, %v1118_v38  ;;  %v1343_v43 = vmul.f32 %v1238_v41, %v1119_v42 }
 0x258   : > { %1712 = vmatmul.f32.gmra.mxu2 %v1334_v7  ;;  %1825 = vmatmul.f32.gmra.mxu3 %v1334_v7 }
 0x259   : > { %1620 = vmatmul.f32.gmra.mxu1 %v1405_v24 }
 0x25d   : > { %1507 = vmatmul.f32.gmra.mxu0 %v1405_v24  ;;  %v1248_v53 = vpop.permute.xlu0 %1247  ;;  %v1253_v59 = vpop.permute.xlu1 %1252 }
 0x25e   : > { %v1345_v55 = vmul.f32 %v1248_v53, %v1121_v54  ;;  %v1346_v61 = vmul.f32 %v1253_v59, %v1122_v60 }
 0x260   : > { %1715 = vmatmul.f32.gmra.mxu2 %v1335_v11  ;;  %1828 = vmatmul.f32.gmra.mxu3 %v1335_v11 }
 0x261   : > { %1623 = vmatmul.f32.gmra.mxu1 %v1406_v28 }
 0x265   : > { %1510 = vmatmul.f32.gmra.mxu0 %v1406_v28  ;;  %v1263_v18 = vpop.permute.xlu0 %1262 }
 0x268   : > { %1718 = vmatmul.f32.gmra.mxu2 %v1336_v15  ;;  %1831 = vmatmul.f32.gmra.mxu3 %v1336_v15  ;;  %v1414_v15 = vld [vmem:[%s3426_s20 + $0xa0] sm:$0xff] }
 0x269   : > { %1626 = vmatmul.f32.gmra.mxu1 %v1407_v32 }
 0x26d   : > { %1513 = vmatmul.f32.gmra.mxu0 %v1407_v32  ;;  %v1268_v32 = vpop.permute.xlu1 %1267  ;;  %v1278_v60 = vpop.permute.xlu0 %1277 }
 0x26e   : > { %v1349_v38 = vmul.f32 %v1268_v32, %v1125_v33 }
 0x270   : > { %1721 = vmatmul.f32.gmra.mxu2 %v1337_v19  ;;  %1834 = vmatmul.f32.gmra.mxu3 %v1337_v19  ;;  %v1124_v19 = vld [vmem:[#allocation2 + $0x40] sm:$0xff] }
 0x271   : > { %1629 = vmatmul.f32.gmra.mxu1 %v1408_v36  ;;  %v1348_v24 = vmul.f32 %v1263_v18, %v1124_v19 }
 0x275   : > { %1516 = vmatmul.f32.gmra.mxu0 %v1408_v36 }
 0x278   : > { %1724 = vmatmul.f32.gmra.mxu2 %v1338_v23  ;;  %1837 = vmatmul.f32.gmra.mxu3 %v1338_v23 }
 0x279   : > { %1632 = vmatmul.f32.gmra.mxu1 %v1409_v40 }
 0x27d   : > { %1519 = vmatmul.f32.gmra.mxu0 %v1409_v40 }
 0x27e   : > { %v1588_v45 = vpop.f32.mrf.mxu1 }
 0x280   : > { %1727 = vmatmul.f32.gmra.mxu2 %v1339_v27  ;;  %1840 = vmatmul.f32.gmra.mxu3 %v1339_v27 }
 0x281   : > { %1635 = vmatmul.f32.gmra.mxu1 %v1410_v46 }
 0x282   : > { %v1475_v44 = vpop.f32.mrf.mxu0 }
 0x285   : > { %1522 = vmatmul.f32.gmra.mxu0 %v1410_v46  ;;  %v1126_v46 = vld [vmem:[#allocation2 + $0xe0] sm:$0xff] }
 0x286   : > { %v1591_v51 = vpop.f32.mrf.mxu1 }
 0x288   : > { %1730 = vmatmul.f32.gmra.mxu2 %v1340_v31  ;;  %1843 = vmatmul.f32.gmra.mxu3 %v1340_v31 }
 0x289   : > { %1638 = vmatmul.f32.gmra.mxu1 %v1411_v52 }
 0x28a   : > { %v1478_v50 = vpop.f32.mrf.mxu0 }
 0x28d   : > { %1525 = vmatmul.f32.gmra.mxu0 %v1411_v52 }
 0x28e   : > { %v3583_v57 = vpop.f32.mrf.mxu1 }
 0x290   : > { %1733 = vmatmul.f32.gmra.mxu2 %v1341_v35  ;;  %1846 = vmatmul.f32.gmra.mxu3 %v1341_v35 }
 0x291   : > { %1641 = vmatmul.f32.gmra.mxu1 %v1412_v58 }
 0x292   : > { %v3581_v56 = vpop.f32.mrf.mxu0 }
 0x295   : > { %1528 = vmatmul.f32.gmra.mxu0 %v1412_v58 }
 0x296   : > { %v3588_v63 = vpop.f32.mrf.mxu1 }
 0x298   : > { %1736 = vmatmul.f32.gmra.mxu2 %v1342_v39  ;;  %1849 = vmatmul.f32.gmra.mxu3 %v1342_v39 }
 0x299   : > { %1644 = vmatmul.f32.gmra.mxu1 %v1413_v0 }
 0x29a   : > { %v3586_v62 = vpop.f32.mrf.mxu0 }
 0x29d   : > { %1531 = vmatmul.f32.gmra.mxu0 %v1413_v0 }
 0x29e   : > { %v3599_v14 = vpop.f32.mrf.mxu1 }
 0x2a0   : > { %1739 = vmatmul.f32.gmra.mxu2 %v1343_v43  ;;  %1852 = vmatmul.f32.gmra.mxu3 %v1343_v43  ;;  %v1416_v43 = vld [vmem:[%s3426_s20 + $0xb0] sm:$0xff] }
 0x2a1   : > { %1647 = vmatmul.f32.gmra.mxu1 %v1414_v15 }
 0x2a2   : > { %v3597_v13 = vpop.f32.mrf.mxu0 }
 0x2a5   : > { %1534 = vmatmul.f32.gmra.mxu0 %v1414_v15 }
 0x2a6   : > { %v3608_v28 = vpop.f32.mrf.mxu1 }
 0x2a8   : > { %1742 = vmatmul.f32.gmra.mxu2 %v1344_v49  ;;  %1855 = vmatmul.f32.gmra.mxu3 %v1344_v49 }
 0x2a9   : > { %1650 = vmatmul.f32.gmra.mxu1 %v1415_v29 }
 0x2aa   : > { %v3606_v27 = vpop.f32.mrf.mxu0 }
 0x2ad   : > { %1537 = vmatmul.f32.gmra.mxu0 %v1415_v29 }
 0x2ae   : > { %v3619_v42 = vpop.f32.mrf.mxu1 }
 0x2b0   : > { %1745 = vmatmul.f32.gmra.mxu2 %v1345_v55  ;;  %1858 = vmatmul.f32.gmra.mxu3 %v1345_v55 }
 0x2b1   : > { %1653 = vmatmul.f32.gmra.mxu1 %v1416_v43 }
 0x2b2   : > { %v3617_v41 = vpop.f32.mrf.mxu0 }
 0x2b5   : > { %1540 = vmatmul.f32.gmra.mxu0 %v1416_v43 }
 0x2b8   : > { %1748 = vmatmul.f32.gmra.mxu2 %v1346_v61  ;;  %1861 = vmatmul.f32.gmra.mxu3 %v1346_v61  ;;  %v1127_v61 = vld [vmem:[#allocation2 + $0x90] sm:$0xff] }
 0x2b9   : > { %v1351_v4 = vmul.f32 %v1278_v60, %v1127_v61 }
 0x2ba   : > { %v3628_v55 = vpop.f32.mrf.mxu0 }
 0x2bb   : > { %v1701_v5 = vpop.f32.mrf.mxu2  ;;  %v1814_v6 = vpop.f32.mrf.mxu3 }
 0x2bc   : > { %v1702_v7 = vadd.f32 %v1701_v5, %v1475_v44  ;;  %v1815_v8 = vadd.f32 %v1814_v6, %v1588_v45 }
 0x2be   : > { %v1916_v11 = vadd.f32 %v3591_v2, %v1702_v7  ;;  %v1917_v12 = vadd.f32 %v3593_v3, %v1815_v8 }
 0x2c0   : > { %v1980_v16 = vmax.f32 %v1916_v11, 0.0  ;;  %v1981_v17 = vmax.f32 %v1917_v12, 0.0  ;;  %1751 = vmatmul.f32.gmra.mxu2 %v1347_v10  ;;  %1864 = vmatmul.f32.gmra.mxu3 %v1347_v10  ;;  %v1283_v12 = vpop.permute.xlu1 %1282 }
 0x2c2   : > { %2044 = vst [vmem:[%s3447_s28] sm:$0xff] %v1980_v16  ;;  %v3639_v7 = vpop.f32.mrf.mxu0 }
 0x2c3   : > { %2045 = vst [vmem:[%s3447_s28 + $0x8] sm:$0xff] %v1981_v17  ;;  %v1704_v20 = vpop.f32.mrf.mxu2  ;;  %v1817_v21 = vpop.f32.mrf.mxu3 }
 0x2c4   : > { %v1705_v22 = vadd.f32 %v1704_v20, %v1478_v50  ;;  %v1818_v23 = vadd.f32 %v1817_v21, %v1591_v51  ;;  %v1273_v51 = vpop.permute.xlu2 %1272 }
 0x2c5   : > { %v1350_v52 = vmul.f32 %v1273_v51, %v1126_v46  ;;  %v1421_v51 = vld [vmem:[%s3426_s20 + $0xd8] sm:$0xff] }
 0x2c6   : > { %v1918_v25 = vadd.f32 %v3591_v2, %v1705_v22  ;;  %v1919_v26 = vadd.f32 %v3593_v3, %v1818_v23  ;;  %v1419_v23 = vld [vmem:[%s3426_s20 + $0xc8] sm:$0xff] }
 0x2c8   : > { %v1982_v30 = vmax.f32 %v1918_v25, 0.0  ;;  %v1983_v31 = vmax.f32 %v1919_v26, 0.0  ;;  %1754 = vmatmul.f32.gmra.mxu2 %v1348_v24  ;;  %1867 = vmatmul.f32.gmra.mxu3 %v1348_v24 }
 0x2ca   : > { %2046 = vst [vmem:[%s3447_s28 + $0x10] sm:$0xff] %v1982_v30  ;;  %v3650_v21 = vpop.f32.mrf.mxu0 }
 0x2cb   : > { %2047 = vst [vmem:[%s3447_s28 + $0x18] sm:$0xff] %v1983_v31  ;;  %v1707_v34 = vpop.f32.mrf.mxu2  ;;  %v1820_v35 = vpop.f32.mrf.mxu3 }
 0x2cc   : > { %v1708_v36 = vadd.f32 %v1707_v34, %v3581_v56  ;;  %v1821_v37 = vadd.f32 %v1820_v35, %v3583_v57  ;;  %v3630_v56 = vpop.f32.mrf.mxu1  ;;  %v1417_v57 = vld [vmem:[%s3426_s20 + $0xb8] sm:$0xff]  ;;  %v1288_v26 = vpop.permute.xlu2 %1287 }
 0x2cd   : > { %1543 = vmatmul.f32.gmra.mxu0 %v1417_v57  ;;  %1656 = vmatmul.f32.gmra.mxu1 %v1417_v57 }
 0x2ce   : > { %v1920_v39 = vadd.f32 %v3591_v2, %v1708_v36  ;;  %v1921_v40 = vadd.f32 %v3593_v3, %v1821_v37  ;;  %v1420_v37 = vld [vmem:[%s3426_s20 + $0xd0] sm:$0xff] }
 0x2d0   : > { %v1984_v44 = vmax.f32 %v1920_v39, 0.0  ;;  %v1985_v45 = vmax.f32 %v1921_v40, 0.0  ;;  %1757 = vmatmul.f32.gmra.mxu2 %v1349_v38  ;;  %1870 = vmatmul.f32.gmra.mxu3 %v1349_v38  ;;  %v1293_v40 = vpop.permute.xlu0 %1292 }
 0x2d2   : > { %2048 = vst [vmem:[%s3447_s28 + $0x20] sm:$0xff] %v1984_v44  ;;  %v3661_v35 = vpop.f32.mrf.mxu0 }
 0x2d3   : > { %2049 = vst [vmem:[%s3447_s28 + $0x28] sm:$0xff] %v1985_v45  ;;  %v1710_v47 = vpop.f32.mrf.mxu2  ;;  %v1823_v48 = vpop.f32.mrf.mxu3 }
 0x2d4   : > { %v1711_v49 = vadd.f32 %v1710_v47, %v3586_v62  ;;  %v1824_v50 = vadd.f32 %v1823_v48, %v3588_v63  ;;  %v3641_v8 = vpop.f32.mrf.mxu1 }
 0x2d5   : > { %1546 = vmatmul.f32.gmra.mxu0 %v1418_v9  ;;  %1659 = vmatmul.f32.gmra.mxu1 %v1418_v9 }
 0x2d6   : > { %v1922_v53 = vadd.f32 %v3591_v2, %v1711_v49  ;;  %v1923_v54 = vadd.f32 %v3593_v3, %v1824_v50 }
 0x2d8   : > { %v1986_v58 = vmax.f32 %v1922_v53, 0.0  ;;  %v1987_v59 = vmax.f32 %v1923_v54, 0.0  ;;  %1760 = vmatmul.f32.gmra.mxu2 %v1350_v52  ;;  %1873 = vmatmul.f32.gmra.mxu3 %v1350_v52  ;;  %v1298_v54 = vpop.permute.xlu1 %1297 }
 0x2da   : > { %2050 = vst [vmem:[%s3447_s28 + $0x30] sm:$0xff] %v1986_v58  ;;  %v3672_v49 = vpop.f32.mrf.mxu0 }
 0x2db   : > { %2051 = vst [vmem:[%s3447_s28 + $0x38] sm:$0xff] %v1987_v59  ;;  %v1713_v62 = vpop.f32.mrf.mxu2  ;;  %v1826_v63 = vpop.f32.mrf.mxu3 }
 0x2dc   : > { %v1714_v0 = vadd.f32 %v1713_v62, %v3597_v13  ;;  %v1827_v1 = vadd.f32 %v1826_v63, %v3599_v14  ;;  %v1128_v13 = vld [vmem:[#allocation2 + $0x70] sm:$0xff]  ;;  %v3652_v22 = vpop.f32.mrf.mxu1 }
 0x2dd   : > { %v1352_v18 = vmul.f32 %v1283_v12, %v1128_v13  ;;  %1549 = vmatmul.f32.gmra.mxu0 %v1419_v23  ;;  %1662 = vmatmul.f32.gmra.mxu1 %v1419_v23 }
 0x2de   : > { %v1924_v5 = vadd.f32 %v3591_v2, %v1714_v0  ;;  %v1925_v6 = vadd.f32 %v3593_v3, %v1827_v1  ;;  %v1422_v1 = vld [vmem:[%s3426_s20 + $0xe0] sm:$0xff] }
 0x2e0   : > { %v1988_v10 = vmax.f32 %v1924_v5, 0.0  ;;  %v1989_v11 = vmax.f32 %v1925_v6, 0.0  ;;  %1763 = vmatmul.f32.gmra.mxu2 %v1351_v4  ;;  %1876 = vmatmul.f32.gmra.mxu3 %v1351_v4  ;;  %v1303_v6 = vpop.permute.xlu2 %1302 }
 0x2e2   : > { %2052 = vst [vmem:[%s3447_s28 + $0x40] sm:$0xff] %v1988_v10  ;;  %v3683_v63 = vpop.f32.mrf.mxu0 }
 0x2e3   : > { %2053 = vst [vmem:[%s3447_s28 + $0x48] sm:$0xff] %v1989_v11  ;;  %v1716_v14 = vpop.f32.mrf.mxu2  ;;  %v1829_v15 = vpop.f32.mrf.mxu3 }
 0x2e4   : > { %v1717_v16 = vadd.f32 %v1716_v14, %v3606_v27  ;;  %v1830_v17 = vadd.f32 %v1829_v15, %v3608_v28  ;;  %v1129_v27 = vld [vmem:[#allocation2 + $0xc0] sm:$0xff]  ;;  %v3663_v36 = vpop.f32.mrf.mxu1 }
 0x2e5   : > { %v1353_v32 = vmul.f32 %v1288_v26, %v1129_v27  ;;  %1552 = vmatmul.f32.gmra.mxu0 %v1420_v37  ;;  %1665 = vmatmul.f32.gmra.mxu1 %v1420_v37 }
 0x2e6   : > { %v1926_v19 = vadd.f32 %v3591_v2, %v1717_v16  ;;  %v1927_v20 = vadd.f32 %v3593_v3, %v1830_v17  ;;  %v1423_v17 = vld [vmem:[%s3426_s20 + $0xe8] sm:$0xff] }
 0x2e8   : > { %v1990_v24 = vmax.f32 %v1926_v19, 0.0  ;;  %v1991_v25 = vmax.f32 %v1927_v20, 0.0  ;;  %1766 = vmatmul.f32.gmra.mxu2 %v1352_v18  ;;  %1879 = vmatmul.f32.gmra.mxu3 %v1352_v18  ;;  %v1308_v20 = vpop.permute.xlu0 %1307 }
 0x2ea   : > { %2054 = vst [vmem:[%s3447_s28 + $0x50] sm:$0xff] %v1990_v24  ;;  %v3694_v15 = vpop.f32.mrf.mxu0 }
 0x2eb   : > { %2055 = vst [vmem:[%s3447_s28 + $0x58] sm:$0xff] %v1991_v25  ;;  %v1719_v28 = vpop.f32.mrf.mxu2  ;;  %v1832_v29 = vpop.f32.mrf.mxu3 }
 0x2ec   : > { %v1720_v30 = vadd.f32 %v1719_v28, %v3617_v41  ;;  %v1833_v31 = vadd.f32 %v1832_v29, %v3619_v42  ;;  %v1130_v41 = vld [vmem:[#allocation2 + $0xa8] sm:$0xff]  ;;  %v3674_v50 = vpop.f32.mrf.mxu1 }
 0x2ed   : > { %v1354_v46 = vmul.f32 %v1293_v40, %v1130_v41  ;;  %1555 = vmatmul.f32.gmra.mxu0 %v1421_v51  ;;  %1668 = vmatmul.f32.gmra.mxu1 %v1421_v51 }
 0x2ee   : > { %v1928_v33 = vadd.f32 %v3591_v2, %v1720_v30  ;;  %v1929_v34 = vadd.f32 %v3593_v3, %v1833_v31  ;;  %v1424_v31 = vld [vmem:[%s3426_s20 + $0xf0] sm:$0xff] }
 0x2f0   : > { %v1992_v38 = vmax.f32 %v1928_v33, 0.0  ;;  %v1993_v39 = vmax.f32 %v1929_v34, 0.0  ;;  %1769 = vmatmul.f32.gmra.mxu2 %v1353_v32  ;;  %1882 = vmatmul.f32.gmra.mxu3 %v1353_v32  ;;  %v1313_v34 = vpop.permute.xlu1 %1312 }
 0x2f2   : > { %2056 = vst [vmem:[%s3447_s28 + $0x60] sm:$0xff] %v1992_v38  ;;  %v3705_v29 = vpop.f32.mrf.mxu0 }
 0x2f3   : > { %2057 = vst [vmem:[%s3447_s28 + $0x68] sm:$0xff] %v1993_v39  ;;  %v1722_v42 = vpop.f32.mrf.mxu2  ;;  %v1835_v43 = vpop.f32.mrf.mxu3 }
 0x2f4   : > { %v1723_v44 = vadd.f32 %v1722_v42, %v3628_v55  ;;  %v1836_v45 = vadd.f32 %v1835_v43, %v3630_v56  ;;  %v1131_v55 = vld [vmem:[#allocation2 + $0xd0] sm:$0xff]  ;;  %v3685_v0 = vpop.f32.mrf.mxu1 }
 0x2f5   : > { %v1355_v60 = vmul.f32 %v1298_v54, %v1131_v55  ;;  %1558 = vmatmul.f32.gmra.mxu0 %v1422_v1  ;;  %1671 = vmatmul.f32.gmra.mxu1 %v1422_v1 }
 0x2f6   : > { %v1930_v47 = vadd.f32 %v3591_v2, %v1723_v44  ;;  %v1931_v48 = vadd.f32 %v3593_v3, %v1836_v45  ;;  %v1425_v45 = vld [vmem:[%s3426_s20 + $0xf8] sm:$0xff] }
 0x2f8   : > { %v1994_v52 = vmax.f32 %v1930_v47, 0.0  ;;  %v1995_v53 = vmax.f32 %v1931_v48, 0.0  ;;  %1772 = vmatmul.f32.gmra.mxu2 %v1354_v46  ;;  %1885 = vmatmul.f32.gmra.mxu3 %v1354_v46  ;;  %v1318_v48 = vpop.permute.xlu2 %1317 }
 0x2fa   : > { %2058 = vst [vmem:[%s3447_s28 + $0x70] sm:$0xff] %v1994_v52  ;;  %v3716_v43 = vpop.f32.mrf.mxu0 }
 0x2fb   : > { %2059 = vst [vmem:[%s3447_s28 + $0x78] sm:$0xff] %v1995_v53  ;;  %v1725_v56 = vpop.f32.mrf.mxu2  ;;  %v1838_v57 = vpop.f32.mrf.mxu3 }
 0x2fc   : > { %v1726_v58 = vadd.f32 %v1725_v56, %v3639_v7  ;;  %v1839_v59 = vadd.f32 %v1838_v57, %v3641_v8  ;;  %v1132_v7 = vld [vmem:[#allocation2 + $0x10] sm:$0xff]  ;;  %v3696_v16 = vpop.f32.mrf.mxu1 }
 0x2fd   : > { %v1356_v12 = vmul.f32 %v1303_v6, %v1132_v7  ;;  %1561 = vmatmul.f32.gmra.mxu0 %v1423_v17  ;;  %1674 = vmatmul.f32.gmra.mxu1 %v1423_v17 }
 0x2fe   : > { %v1932_v61 = vadd.f32 %v3591_v2, %v1726_v58  ;;  %v1933_v62 = vadd.f32 %v3593_v3, %v1839_v59 }
 0x300   : > { %v1996_v4 = vmax.f32 %v1932_v61, 0.0  ;;  %v1997_v5 = vmax.f32 %v1933_v62, 0.0  ;;  %1775 = vmatmul.f32.gmra.mxu2 %v1355_v60  ;;  %1888 = vmatmul.f32.gmra.mxu3 %v1355_v60  ;;  %v1323_v61 = vpop.permute.xlu0 %1322  ;;  %v1136_v62 = vld [vmem:[#allocation2 + $0x20] sm:$0xff] }
 0x302   : > { %2060 = vst [vmem:[%s3447_s28 + $0x80] sm:$0xff] %v1996_v4  ;;  %v1523_v57 = vpop.f32.mrf.mxu0 }
 0x303   : > { %2061 = vst [vmem:[%s3447_s28 + $0x88] sm:$0xff] %v1997_v5  ;;  %v1728_v8 = vpop.f32.mrf.mxu2  ;;  %v1841_v9 = vpop.f32.mrf.mxu3  ;;  %v1360_v5 = vmul.f32 %v1323_v61, %v1136_v62 }
 0x304   : > { %v1729_v10 = vadd.f32 %v1728_v8, %v3650_v21  ;;  %v1842_v11 = vadd.f32 %v1841_v9, %v3652_v22  ;;  %v1133_v21 = vld [vmem:[#allocation2 + $0x28] sm:$0xff]  ;;  %v3707_v30 = vpop.f32.mrf.mxu1 }
 0x305   : > { %v1357_v26 = vmul.f32 %v1308_v20, %v1133_v21  ;;  %1564 = vmatmul.f32.gmra.mxu0 %v1424_v31  ;;  %1677 = vmatmul.f32.gmra.mxu1 %v1424_v31 }
 0x306   : > { %v1934_v13 = vadd.f32 %v3591_v2, %v1729_v10  ;;  %v1935_v14 = vadd.f32 %v3593_v3, %v1842_v11 }
 0x308   : > { %v1998_v18 = vmax.f32 %v1934_v13, 0.0  ;;  %v1999_v19 = vmax.f32 %v1935_v14, 0.0  ;;  %1778 = vmatmul.f32.gmra.mxu2 %v1356_v12  ;;  %1891 = vmatmul.f32.gmra.mxu3 %v1356_v12  ;;  %v1328_v12 = vpop.permute.xlu1 %1327  ;;  %v1137_v13 = vld [vmem:[#allocation2 + $0x98] sm:$0xff] }
 0x30a   : > { %2062 = vst [vmem:[%s3447_s28 + $0x90] sm:$0xff] %v1998_v18  ;;  %v1526_v8 = vpop.f32.mrf.mxu0  ;;  %v1361_v18 = vmul.f32 %v1328_v12, %v1137_v13 }
 0x30b   : > { %2063 = vst [vmem:[%s3447_s28 + $0x98] sm:$0xff] %v1999_v19  ;;  %v1731_v22 = vpop.f32.mrf.mxu2  ;;  %v1844_v23 = vpop.f32.mrf.mxu3 }
 0x30c   : > { %v1732_v24 = vadd.f32 %v1731_v22, %v3661_v35  ;;  %v1845_v25 = vadd.f32 %v1844_v23, %v3663_v36  ;;  %v1134_v35 = vld [vmem:[#allocation2 + $0xa0] sm:$0xff]  ;;  %v3718_v44 = vpop.f32.mrf.mxu1 }
 0x30d   : > { %v1358_v40 = vmul.f32 %v1313_v34, %v1134_v35  ;;  %1567 = vmatmul.f32.gmra.mxu0 %v1425_v45  ;;  %1680 = vmatmul.f32.gmra.mxu1 %v1425_v45 }
 0x30e   : > { %v1936_v27 = vadd.f32 %v3591_v2, %v1732_v24  ;;  %v1937_v28 = vadd.f32 %v3593_v3, %v1845_v25 }
 0x310   : > { %v2000_v32 = vmax.f32 %v1936_v27, 0.0  ;;  %v2001_v33 = vmax.f32 %v1937_v28, 0.0  ;;  %1781 = vmatmul.f32.gmra.mxu2 %v1357_v26  ;;  %1894 = vmatmul.f32.gmra.mxu3 %v1357_v26 }
 0x312   : > { %2064 = vst [vmem:[%s3447_s28 + $0xa0] sm:$0xff] %v2000_v32  ;;  %v1529_v21 = vpop.f32.mrf.mxu0 }
 0x313   : > { %2065 = vst [vmem:[%s3447_s28 + $0xa8] sm:$0xff] %v2001_v33  ;;  %v1734_v36 = vpop.f32.mrf.mxu2  ;;  %v1847_v37 = vpop.f32.mrf.mxu3 }
 0x314   : > { %v1735_v38 = vadd.f32 %v1734_v36, %v3672_v49  ;;  %v1848_v39 = vadd.f32 %v1847_v37, %v3674_v50  ;;  %v1135_v49 = vld [vmem:[#allocation2 + $0xf8] sm:$0xff]  ;;  %v1636_v58 = vpop.f32.mrf.mxu1 }
 0x315   : > { %v1359_v54 = vmul.f32 %v1318_v48, %v1135_v49 }
 0x316   : > { %v1938_v41 = vadd.f32 %v3591_v2, %v1735_v38  ;;  %v1939_v42 = vadd.f32 %v3593_v3, %v1848_v39 }
 0x318   : > { %v2002_v46 = vmax.f32 %v1938_v41, 0.0  ;;  %v2003_v47 = vmax.f32 %v1939_v42, 0.0  ;;  %1784 = vmatmul.f32.gmra.mxu2 %v1358_v40  ;;  %1897 = vmatmul.f32.gmra.mxu3 %v1358_v40 }
 0x31a   : > { %2066 = vst [vmem:[%s3447_s28 + $0xb0] sm:$0xff] %v2002_v46  ;;  %v1532_v33 = vpop.f32.mrf.mxu0 }
 0x31b   : > { %2067 = vst [vmem:[%s3447_s28 + $0xb8] sm:$0xff] %v2003_v47  ;;  %v1737_v50 = vpop.f32.mrf.mxu2  ;;  %v1850_v51 = vpop.f32.mrf.mxu3 }
 0x31c   : > { %v1738_v52 = vadd.f32 %v1737_v50, %v3683_v63  ;;  %v1851_v53 = vadd.f32 %v1850_v51, %v3685_v0  ;;  %v1639_v9 = vpop.f32.mrf.mxu1 }
 0x31e   : > { %v1940_v55 = vadd.f32 %v3591_v2, %v1738_v52  ;;  %v1941_v56 = vadd.f32 %v3593_v3, %v1851_v53 }
 0x320   : > { %v2004_v59 = vmax.f32 %v1940_v55, 0.0  ;;  %v2005_v60 = vmax.f32 %v1941_v56, 0.0  ;;  %1787 = vmatmul.f32.gmra.mxu2 %v1359_v54  ;;  %1900 = vmatmul.f32.gmra.mxu3 %v1359_v54 }
 0x322   : > { %2068 = vst [vmem:[%s3447_s28 + $0xc0] sm:$0xff] %v2004_v59 }
 0x323   : > { %2069 = vst [vmem:[%s3447_s28 + $0xc8] sm:$0xff] %v2005_v60  ;;  %v1740_v1 = vpop.f32.mrf.mxu2  ;;  %v1853_v63 = vpop.f32.mrf.mxu3 }
 0x324   : > { %v1741_v0 = vadd.f32 %v1740_v1, %v3694_v15  ;;  %v1854_v4 = vadd.f32 %v1853_v63, %v3696_v16  ;;  %v1642_v22 = vpop.f32.mrf.mxu1 }
 0x326   : > { %v1942_v6 = vadd.f32 %v3591_v2, %v1741_v0  ;;  %v1943_v7 = vadd.f32 %v3593_v3, %v1854_v4 }
 0x328   : > { %v2006_v10 = vmax.f32 %v1942_v6, 0.0  ;;  %v2007_v11 = vmax.f32 %v1943_v7, 0.0  ;;  %1790 = vmatmul.f32.gmra.mxu2 %v1360_v5  ;;  %1903 = vmatmul.f32.gmra.mxu3 %v1360_v5 }
 0x32a   : > { %2070 = vst [vmem:[%s3447_s28 + $0xd0] sm:$0xff] %v2006_v10 }
 0x32b   : > { %2071 = vst [vmem:[%s3447_s28 + $0xd8] sm:$0xff] %v2007_v11  ;;  %v1743_v14 = vpop.f32.mrf.mxu2  ;;  %v1856_v15 = vpop.f32.mrf.mxu3 }
 0x32c   : > { %v1744_v16 = vadd.f32 %v1743_v14, %v3705_v29  ;;  %v1857_v17 = vadd.f32 %v1856_v15, %v3707_v30  ;;  %v1645_v34 = vpop.f32.mrf.mxu1 }
 0x32e   : > { %v1944_v19 = vadd.f32 %v3591_v2, %v1744_v16  ;;  %v1945_v20 = vadd.f32 %v3593_v3, %v1857_v17 }
 0x330   : > { %v2008_v23 = vmax.f32 %v1944_v19, 0.0  ;;  %v2009_v24 = vmax.f32 %v1945_v20, 0.0  ;;  %1793 = vmatmul.f32.gmra.mxu2 %v1361_v18  ;;  %1906 = vmatmul.f32.gmra.mxu3 %v1361_v18 }
 0x332   : > { %2072 = vst [vmem:[%s3447_s28 + $0xe0] sm:$0xff] %v2008_v23 }
 0x333   : > { %2073 = vst [vmem:[%s3447_s28 + $0xe8] sm:$0xff] %v2009_v24  ;;  %v1746_v25 = vpop.f32.mrf.mxu2  ;;  %v1859_v26 = vpop.f32.mrf.mxu3 }
 0x334   : > { %v1747_v27 = vadd.f32 %v1746_v25, %v3716_v43  ;;  %v1860_v28 = vadd.f32 %v1859_v26, %v3718_v44  ;;  %v1535_v43 = vpop.f32.mrf.mxu0  ;;  %v1648_v44 = vpop.f32.mrf.mxu1 }
 0x336   : > { %v1946_v29 = vadd.f32 %v3591_v2, %v1747_v27  ;;  %v1947_v30 = vadd.f32 %v3593_v3, %v1860_v28 }
 0x338   : > { %v2010_v31 = vmax.f32 %v1946_v29, 0.0  ;;  %v2011_v32 = vmax.f32 %v1947_v30, 0.0 }
 0x33a   : > { %2074 = vst [vmem:[%s3447_s28 + $0xf0] sm:$0xff] %v2010_v31 }
 0x33b   : > { %2075 = vst [vmem:[%s3447_s28 + $0xf8] sm:$0xff] %v2011_v32  ;;  %v1749_v35 = vpop.f32.mrf.mxu2  ;;  %v1862_v36 = vpop.f32.mrf.mxu3 }
 0x33c   : > { %v1750_v37 = vadd.f32 %v1749_v35, %v1523_v57  ;;  %v1863_v38 = vadd.f32 %v1862_v36, %v1636_v58  ;;  %v1538_v57 = vpop.f32.mrf.mxu0  ;;  %v1651_v58 = vpop.f32.mrf.mxu1 }
 0x33e   : > { %v1948_v39 = vadd.f32 %v3591_v2, %v1750_v37  ;;  %v1949_v40 = vadd.f32 %v3593_v3, %v1863_v38 }
 0x340   : > { %v2012_v41 = vmax.f32 %v1948_v39, 0.0  ;;  %v2013_v42 = vmax.f32 %v1949_v40, 0.0 }
 0x342   : > { %2076 = vst [vmem:[%s3447_s28 + $0x100] sm:$0xff] %v2012_v41 }
 0x343   : > { %2077 = vst [vmem:[%s3447_s28 + $0x108] sm:$0xff] %v2013_v42  ;;  %v1752_v45 = vpop.f32.mrf.mxu2  ;;  %v1865_v46 = vpop.f32.mrf.mxu3 }
 0x344   : > { %v1753_v47 = vadd.f32 %v1752_v45, %v1526_v8  ;;  %v1866_v48 = vadd.f32 %v1865_v46, %v1639_v9  ;;  %v1541_v7 = vpop.f32.mrf.mxu0  ;;  %v1654_v8 = vpop.f32.mrf.mxu1 }
 0x346   : > { %v1950_v49 = vadd.f32 %v3591_v2, %v1753_v47  ;;  %v1951_v50 = vadd.f32 %v3593_v3, %v1866_v48 }
 0x348   : > { %v2014_v51 = vmax.f32 %v1950_v49, 0.0  ;;  %v2015_v52 = vmax.f32 %v1951_v50, 0.0 }
 0x34a   : > { %2078 = vst [vmem:[%s3447_s28 + $0x110] sm:$0xff] %v2014_v51 }
 0x34b   : > { %2079 = vst [vmem:[%s3447_s28 + $0x118] sm:$0xff] %v2015_v52  ;;  %v1755_v53 = vpop.f32.mrf.mxu2  ;;  %v1868_v54 = vpop.f32.mrf.mxu3 }
 0x34c   : > { %v1756_v55 = vadd.f32 %v1755_v53, %v1529_v21  ;;  %v1869_v56 = vadd.f32 %v1868_v54, %v1642_v22  ;;  %v1544_v19 = vpop.f32.mrf.mxu0  ;;  %v1657_v20 = vpop.f32.mrf.mxu1 }
 0x34e   : > { %v1952_v59 = vadd.f32 %v3591_v2, %v1756_v55  ;;  %v1953_v60 = vadd.f32 %v3593_v3, %v1869_v56 }
 0x350   : > { %v2016_v61 = vmax.f32 %v1952_v59, 0.0  ;;  %v2017_v62 = vmax.f32 %v1953_v60, 0.0 }
 0x352   : > { %2080 = vst [vmem:[%s3447_s28 + $0x120] sm:$0xff] %v2016_v61 }
 0x353   : > { %2081 = vst [vmem:[%s3447_s28 + $0x128] sm:$0xff] %v2017_v62  ;;  %v1758_v1 = vpop.f32.mrf.mxu2  ;;  %v1871_v63 = vpop.f32.mrf.mxu3 }
 0x354   : > { %v1759_v0 = vadd.f32 %v1758_v1, %v1532_v33  ;;  %v1872_v4 = vadd.f32 %v1871_v63, %v1645_v34  ;;  %v1547_v29 = vpop.f32.mrf.mxu0  ;;  %v1660_v30 = vpop.f32.mrf.mxu1 }
 0x356   : > { %v1954_v5 = vadd.f32 %v3591_v2, %v1759_v0  ;;  %v1955_v6 = vadd.f32 %v3593_v3, %v1872_v4 }
 0x358   : > { %v2018_v9 = vmax.f32 %v1954_v5, 0.0  ;;  %v2019_v10 = vmax.f32 %v1955_v6, 0.0 }
 0x35a   : > { %2082 = vst [vmem:[%s3447_s28 + $0x130] sm:$0xff] %v2018_v9 }
 0x35b   : > { %2083 = vst [vmem:[%s3447_s28 + $0x138] sm:$0xff] %v2019_v10  ;;  %v1761_v11 = vpop.f32.mrf.mxu2  ;;  %v1874_v12 = vpop.f32.mrf.mxu3 }
 0x35c   : > { %v1762_v13 = vadd.f32 %v1761_v11, %v1535_v43  ;;  %v1875_v14 = vadd.f32 %v1874_v12, %v1648_v44  ;;  %v1550_v43 = vpop.f32.mrf.mxu0  ;;  %v1663_v44 = vpop.f32.mrf.mxu1 }
 0x35e   : > { %v1956_v15 = vadd.f32 %v3591_v2, %v1762_v13  ;;  %v1957_v16 = vadd.f32 %v3593_v3, %v1875_v14 }
 0x360   : > { %v2020_v17 = vmax.f32 %v1956_v15, 0.0  ;;  %v2021_v18 = vmax.f32 %v1957_v16, 0.0 }
 0x362   : > { %2084 = vst [vmem:[%s3447_s28 + $0x140] sm:$0xff] %v2020_v17 }
 0x363   : > { %2085 = vst [vmem:[%s3447_s28 + $0x148] sm:$0xff] %v2021_v18  ;;  %v1764_v21 = vpop.f32.mrf.mxu2  ;;  %v1877_v22 = vpop.f32.mrf.mxu3 }
 0x364   : > { %v1765_v23 = vadd.f32 %v1764_v21, %v1538_v57  ;;  %v1878_v24 = vadd.f32 %v1877_v22, %v1651_v58  ;;  %v1553_v55 = vpop.f32.mrf.mxu0  ;;  %v1666_v56 = vpop.f32.mrf.mxu1 }
 0x366   : > { %v1958_v25 = vadd.f32 %v3591_v2, %v1765_v23  ;;  %v1959_v26 = vadd.f32 %v3593_v3, %v1878_v24 }
 0x368   : > { %v2022_v27 = vmax.f32 %v1958_v25, 0.0  ;;  %v2023_v28 = vmax.f32 %v1959_v26, 0.0 }
 0x36a   : > { %2086 = vst [vmem:[%s3447_s28 + $0x150] sm:$0xff] %v2022_v27 }
 0x36b   : > { %2087 = vst [vmem:[%s3447_s28 + $0x158] sm:$0xff] %v2023_v28  ;;  %v1767_v31 = vpop.f32.mrf.mxu2  ;;  %v1880_v32 = vpop.f32.mrf.mxu3 }
 0x36c   : > { %v1768_v33 = vadd.f32 %v1767_v31, %v1541_v7  ;;  %v1881_v34 = vadd.f32 %v1880_v32, %v1654_v8  ;;  %v1556_v5 = vpop.f32.mrf.mxu0  ;;  %v1669_v6 = vpop.f32.mrf.mxu1 }
 0x36e   : > { %v1960_v35 = vadd.f32 %v3591_v2, %v1768_v33  ;;  %v1961_v36 = vadd.f32 %v3593_v3, %v1881_v34 }
 0x370   : > { %v2024_v37 = vmax.f32 %v1960_v35, 0.0  ;;  %v2025_v38 = vmax.f32 %v1961_v36, 0.0 }
 0x372   : > { %2088 = vst [vmem:[%s3447_s28 + $0x160] sm:$0xff] %v2024_v37 }
 0x373   : > { %2089 = vst [vmem:[%s3447_s28 + $0x168] sm:$0xff] %v2025_v38  ;;  %v1770_v39 = vpop.f32.mrf.mxu2  ;;  %v1883_v40 = vpop.f32.mrf.mxu3 }
 0x374   : > { %v1771_v41 = vadd.f32 %v1770_v39, %v1544_v19  ;;  %v1884_v42 = vadd.f32 %v1883_v40, %v1657_v20  ;;  %v1559_v15 = vpop.f32.mrf.mxu0  ;;  %v1672_v16 = vpop.f32.mrf.mxu1 }
 0x376   : > { %v1962_v45 = vadd.f32 %v3591_v2, %v1771_v41  ;;  %v1963_v46 = vadd.f32 %v3593_v3, %v1884_v42 }
 0x378   : > { %v2026_v47 = vmax.f32 %v1962_v45, 0.0  ;;  %v2027_v48 = vmax.f32 %v1963_v46, 0.0 }
 0x37a   : > { %2090 = vst [vmem:[%s3447_s28 + $0x170] sm:$0xff] %v2026_v47 }
 0x37b   : > { %2091 = vst [vmem:[%s3447_s28 + $0x178] sm:$0xff] %v2027_v48  ;;  %v1773_v49 = vpop.f32.mrf.mxu2  ;;  %v1886_v50 = vpop.f32.mrf.mxu3 }
 0x37c   : > { %v1774_v51 = vadd.f32 %v1773_v49, %v1547_v29  ;;  %v1887_v52 = vadd.f32 %v1886_v50, %v1660_v30  ;;  %v1562_v29 = vpop.f32.mrf.mxu0  ;;  %v1675_v30 = vpop.f32.mrf.mxu1 }
 0x37e   : > { %v1964_v53 = vadd.f32 %v3591_v2, %v1774_v51  ;;  %v1965_v54 = vadd.f32 %v3593_v3, %v1887_v52 }
 0x380   : > { %v2028_v57 = vmax.f32 %v1964_v53, 0.0  ;;  %v2029_v58 = vmax.f32 %v1965_v54, 0.0 }
 0x382   : > { %2092 = vst [vmem:[%s3447_s28 + $0x180] sm:$0xff] %v2028_v57 }
 0x383   : > { %2093 = vst [vmem:[%s3447_s28 + $0x188] sm:$0xff] %v2029_v58  ;;  %v1776_v59 = vpop.f32.mrf.mxu2  ;;  %v1889_v60 = vpop.f32.mrf.mxu3 }
 0x384   : > { %v1777_v61 = vadd.f32 %v1776_v59, %v1550_v43  ;;  %v1890_v62 = vadd.f32 %v1889_v60, %v1663_v44  ;;  %v1565_v41 = vpop.f32.mrf.mxu0  ;;  %v1678_v42 = vpop.f32.mrf.mxu1 }
 0x386   : > { %v1966_v1 = vadd.f32 %v3591_v2, %v1777_v61  ;;  %v1967_v63 = vadd.f32 %v3593_v3, %v1890_v62 }
 0x388   : > { %v2030_v0 = vmax.f32 %v1966_v1, 0.0  ;;  %v2031_v4 = vmax.f32 %v1967_v63, 0.0 }
 0x38a   : > { %2094 = vst [vmem:[%s3447_s28 + $0x190] sm:$0xff] %v2030_v0 }
 0x38b   : > { %2095 = vst [vmem:[%s3447_s28 + $0x198] sm:$0xff] %v2031_v4  ;;  %v1779_v7 = vpop.f32.mrf.mxu2  ;;  %v1892_v8 = vpop.f32.mrf.mxu3 }
 0x38c   : > { %v1780_v9 = vadd.f32 %v1779_v7, %v1553_v55  ;;  %v1893_v10 = vadd.f32 %v1892_v8, %v1666_v56  ;;  %v1568_v53 = vpop.f32.mrf.mxu0  ;;  %v1681_v54 = vpop.f32.mrf.mxu1 }
 0x38e   : > { %v1968_v11 = vadd.f32 %v3591_v2, %v1780_v9  ;;  %v1969_v12 = vadd.f32 %v3593_v3, %v1893_v10 }
 0x390   : > { %v2032_v13 = vmax.f32 %v1968_v11, 0.0  ;;  %v2033_v14 = vmax.f32 %v1969_v12, 0.0 }
 0x392   : > { %2096 = vst [vmem:[%s3447_s28 + $0x1a0] sm:$0xff] %v2032_v13 }
 0x393   : > { %2097 = vst [vmem:[%s3447_s28 + $0x1a8] sm:$0xff] %v2033_v14  ;;  %v1782_v17 = vpop.f32.mrf.mxu2  ;;  %v1895_v18 = vpop.f32.mrf.mxu3 }
 0x394   : > { %v1783_v19 = vadd.f32 %v1782_v17, %v1556_v5  ;;  %v1896_v20 = vadd.f32 %v1895_v18, %v1669_v6 }
 0x396   : > { %v1970_v21 = vadd.f32 %v3591_v2, %v1783_v19  ;;  %v1971_v22 = vadd.f32 %v3593_v3, %v1896_v20 }
 0x398   : > { %v2034_v23 = vmax.f32 %v1970_v21, 0.0  ;;  %v2035_v24 = vmax.f32 %v1971_v22, 0.0 }
 0x39a   : > { %2098 = vst [vmem:[%s3447_s28 + $0x1b0] sm:$0xff] %v2034_v23 }
 0x39b   : > { %2099 = vst [vmem:[%s3447_s28 + $0x1b8] sm:$0xff] %v2035_v24  ;;  %v1785_v25 = vpop.f32.mrf.mxu2  ;;  %v1898_v26 = vpop.f32.mrf.mxu3 }
 0x39c   : > { %v1786_v27 = vadd.f32 %v1785_v25, %v1559_v15  ;;  %v1899_v28 = vadd.f32 %v1898_v26, %v1672_v16 }
 0x39e   : > { %v1972_v31 = vadd.f32 %v3591_v2, %v1786_v27  ;;  %v1973_v32 = vadd.f32 %v3593_v3, %v1899_v28 }
 0x3a0   : > { %v2036_v33 = vmax.f32 %v1972_v31, 0.0  ;;  %v2037_v34 = vmax.f32 %v1973_v32, 0.0 }
 0x3a2   : > { %2100 = vst [vmem:[%s3447_s28 + $0x1c0] sm:$0xff] %v2036_v33 }
 0x3a3   : > { %2101 = vst [vmem:[%s3447_s28 + $0x1c8] sm:$0xff] %v2037_v34  ;;  %v1788_v35 = vpop.f32.mrf.mxu2  ;;  %v1901_v36 = vpop.f32.mrf.mxu3 }
 0x3a4   : > { %v1789_v37 = vadd.f32 %v1788_v35, %v1562_v29  ;;  %v1902_v38 = vadd.f32 %v1901_v36, %v1675_v30 }
 0x3a6   : > { %v1974_v39 = vadd.f32 %v3591_v2, %v1789_v37  ;;  %v1975_v40 = vadd.f32 %v3593_v3, %v1902_v38 }
 0x3a8   : > { %v2038_v43 = vmax.f32 %v1974_v39, 0.0  ;;  %v2039_v44 = vmax.f32 %v1975_v40, 0.0 }
 0x3aa   : > { %2102 = vst [vmem:[%s3447_s28 + $0x1d0] sm:$0xff] %v2038_v43 }
 0x3ab   : > { %2103 = vst [vmem:[%s3447_s28 + $0x1d8] sm:$0xff] %v2039_v44  ;;  %v1791_v45 = vpop.f32.mrf.mxu2  ;;  %v1904_v46 = vpop.f32.mrf.mxu3 }
 0x3ac   : > { %v1792_v47 = vadd.f32 %v1791_v45, %v1565_v41  ;;  %v1905_v48 = vadd.f32 %v1904_v46, %v1678_v42 }
 0x3ae   : > { %v1976_v49 = vadd.f32 %v3591_v2, %v1792_v47  ;;  %v1977_v50 = vadd.f32 %v3593_v3, %v1905_v48 }
 0x3b0   : > { %v2040_v51 = vmax.f32 %v1976_v49, 0.0  ;;  %v2041_v52 = vmax.f32 %v1977_v50, 0.0 }
 0x3b2   : > { %2104 = vst [vmem:[%s3447_s28 + $0x1e0] sm:$0xff] %v2040_v51 }
 0x3b3   : > { %2105 = vst [vmem:[%s3447_s28 + $0x1e8] sm:$0xff] %v2041_v52  ;;  %v1794_v55 = vpop.f32.mrf.mxu2  ;;  %v1907_v56 = vpop.f32.mrf.mxu3 }
 0x3b4   : > { %v1795_v57 = vadd.f32 %v1794_v55, %v1568_v53  ;;  %v1908_v58 = vadd.f32 %v1907_v56, %v1681_v54 }
 0x3b6   : > { %v1978_v59 = vadd.f32 %v3591_v2, %v1795_v57  ;;  %v1979_v60 = vadd.f32 %v3593_v3, %v1908_v58 }
 0x3b8   : > { %v2042_v61 = vmax.f32 %v1978_v59, 0.0  ;;  %v2043_v62 = vmax.f32 %v1979_v60, 0.0 }
 0x3ba   : > { %2106 = vst [vmem:[%s3447_s28 + $0x1f0] sm:$0xff] %v2042_v61 }
 0x3bb   : > { %2107 = vst [vmem:[%s3447_s28 + $0x1f8] sm:$0xff] %v2043_v62 }
 0x3bc PF: > { %s3940_s2 = sld [smem:[#allocation24_spill]]  ;;  %s2122_s11 = sshll.u32 %s3447_s28, 4  ;;  %s2123_s11 = int_to_ptr.vmem [resolvable:$true] %s2122_s11 }
 0x3bd   : > { %s3941_s5 = sld [smem:[#allocation39_spill]]  ;;  %s2109_s12 = scalar_lea.sflag [#allocation5], %s3423_s13 }
 0x3c2   : > { %s2575_s1 = sshll.u32 %s3940_s2, 9 }
 0x3c3   : > { %s2121_s6 = scalar_lea.hbm %s3941_s5, %s2575_s1  ;;  %s2974_s23 = scalar_lea.hbm %s3941_s5, 1536 }
 0x3c4   : > { %s2124_s21 = sshll.u32 %s2121_s6, 4  ;;  %s2125_s21 = int_to_ptr.hbm [resolvable:$true] %s2124_s21 }
 0x3c5   : > { %s2968_s20 = sshra.s32 %s2125_s21, 4  ;;  %s2969_s20 = int_to_ptr.hbm [resolvable:$true] %s2968_s20 }
 0x3c6   : > { %s2970_s16 = scalar_lea.hbm %s2969_s20, 512  ;;  %p2975_p7 = scmp.lt.s32.totalorder %s2969_s20, %s3941_s5 }
 0x3c7   : > { %p2971_p0 = scmp.ne.s32.totalorder %s2969_s20, %s2970_s16  ;;  %p2976_p9 = scmp.lt.s32.totalorder %s2974_s23, %s2970_s16 }
 0x3c9   : > { %p2972_p3 = pnand %p2971_p0, %p3381_p11  ;;  %p2977_p10 = por %p2976_p9, %p2975_p7 }
 0x3cb   : > { %p2973_p13 = pneg %p2972_p3 }
 0x3cd   : > { %p2978_p12 = pnand %p2977_p10, %p2973_p13 }
 0x3cf   : > { %2981 = shalt.err (!%p2978_p12)
}
 0x3d0   : > { %s3130_s13 = smov 256   ;;  %s3131_s0 = smov 16  }
 0x3d1   : > { %2611 = dma.vmem_to_hbm [thread:$0]  (%p3381_p11), %s2123_s11, 8192, %s2125_s21, %s2109_s12, %s3130_s13, %s3130_s13, %s3131_s0  }
 0x3d2 PF: > { %p2644_p6 = scmp.ge.s32.totalorder %s3116_s14, 2  ;;  %s2139_s19 = sand.u32 1, %s3064_s24  }
 0x3d3   : > { %s2140_s28 = scalar_lea.sflag [#allocation5], %s2139_s19 }
 0x3d4   : > { %p2634_p2 = pnand %p2644_p6, %p3392_p5 }
 0x3d6   : > { %p2635_p4 = pneg %p2634_p2 }
 0x3d8   : > { %3059 = dma.done.wait (%p2635_p4), %s2140_s28, 8192  }
 0x3d9   : > { %3061 = vsyncadd (%p2635_p4), %s2140_s28, 4294959104  ;;  %s28_s14 = sadd.s32 1, %s3116_s14   ;;  %s3943_s3 = sld [smem:[#allocation21_spill]] }
 0x3da   : > { %p3832_p8 = scmp.ge.s32.totalorder %s28_s14, 11   ;;  %s3944_s28 = sld [smem:[#allocation22_spill]] }
 0x3db   : > { %s3945_s29 = sld [smem:[#allocation30_spill]]  ;;  %s3952_s24 = smov %s3068_s25 }
 0x3dc   : > { %s3946_s15 = sld [smem:[#allocation31_spill]]  ;;  %s3953_s25 = smov %s3072_s26 }
 0x3dd   : > { %s3947_s10 = sld [smem:[#allocation25_spill]]  ;;  %s3954_s26 = smov %s3369_s22 }
 0x3de   : > { %s3948_s11 = sld [smem:[#allocation26_spill]]  ;;  %s3956_s30 = smov %s3092_s8 }
 0x3df   : > { %s3949_s12 = sld [smem:[#allocation28_spill]]  ;;  %s3955_s27 = smov %s3943_s3 }
 0x3e0   : > { %s3950_s13 = sld [smem:[#allocation29_spill]]  ;;  %s3957_s8 = smov %s3096_s9 }
 0x3e1   :  { %27 = sbr.rel (!%p3832_p8) target bundleno = 23 (0x17), region = 140 }
 0x3e2   : > { %s3958_s9 = smov %s3946_s15 }
 0x3e6   :  { %2146 = vsyncpa [#allocation4], 1 }
 0x3e7   :  { %2148 = vsyncpa [#allocation4 + $0x1], 1 }
 0x3e8   :  { %2149 = vsyncpa [#allocation7], 1 }
 0x3e9   :  { %2151 = vsyncpa [#allocation7 + $0x1], 1 }
 0x3ea   :  { %2152 = vsyncpa [#allocation10], 1 }
 0x3eb   :  { %2153 = vsyncpa [#allocation13], 1 }
 0x3ec   :  { %2154 = vsyncpa [#allocation5], 1 }
 0x3ed   :  { %2156 = vsyncpa [#allocation5 + $0x1], 1 }

</bundles_post_ra>
